<compile_context>
chip_gen: v7x
topology: tpu7x:2x2x1
jax: 0.10.0
libtpu: 0.0.40
codegen_flags: <defaults>
</compile_context>

<pallas_src>
import functools

import jax
import jax.numpy as jnp
import numpy as np
from jax import lax
from jax.experimental import pallas as pl
from jax.experimental.pallas import tpu as pltpu

LANE = 128                      # TPU lane width; Cout is zero-padded up to this.
COMPUTE_DTYPE = jnp.bfloat16    # MXU-native input dtype; accumulation stays f32.


def _conv_taps_kernel(x_ref, w_ref, b_ref, o_ref, *, k, cin_p, wp, m_wide, relu):
    """One image per grid step: accumulate K*K shifted-slice matmuls, bias, ReLU.

    x_ref : (1, Hp*Wp, Cin_p)   flattened zero-padded NHWC image (bf16)
    w_ref : (K*K*Cin_p, 128)    conv weight, (kh, kw, cin) row order, Cout->128 (bf16)
    b_ref : (1, 128)            bias, Cout zero-padded to 128 (f32)
    o_ref : (1, M_wide, 128)    lane-dense "wide" output rows (f32)
    """
    acc = jnp.zeros((m_wide, LANE), dtype=jnp.float32)
    for kh in range(k):
        for kw in range(k):
            base = kh * wp + kw                          # static flat offset of this tap
            t = kh * k + kw
            tap = x_ref[0, base:base + m_wide, :]        # (M_wide, Cin_p) contiguous slice
            w_t = w_ref[t * cin_p:(t + 1) * cin_p, :]    # (Cin_p, 128)
            acc = acc + jnp.dot(tap, w_t, preferred_element_type=jnp.float32)
    acc = acc + b_ref[...]                               # (1, 128) broadcast add
    if relu:
        acc = jnp.maximum(acc, 0.0)
    o_ref[0] = acc.astype(o_ref.dtype)                   # full 128-lane (unmasked) store


@functools.partial(jax.jit, static_argnames=("stride", "relu"))
def conv2d_pallas(x_nchw, weight, bias, *, stride, relu):
    """ReLU?(Conv2d(x)) with PyTorch semantics: NCHW in/out, padding = k // 2."""
    n, cin, h, w = x_nchw.shape
    cout, cin_w, k, k_w = weight.shape
    assert cin_w == cin and k_w == k and cout <= LANE and stride <= k

    pad = k // 2
    oh = (h + 2 * pad - k) // stride + 1
    ow = (w + 2 * pad - k) // stride + 1
    wp = w + 2 * pad
    hp = oh * stride + k                  # conv needs (oh-1)*s + k rows; +s extra zero
                                          # rows keep every wide tap slice in bounds.
    cin_p = -(-cin // 8) * 8              # channel pad to a multiple of 8 (sublane-friendly)
    m_wide = oh * stride * wp             # rows/image incl. discarded wrap-around columns

    # ---- layout glue on the 1x-sized input (NO 9x im2col patches in HBM) ----
    x_nhwc = jnp.transpose(x_nchw, (0, 2, 3, 1))
    xp = jnp.pad(x_nhwc, ((0, 0), (pad, hp - h - pad), (pad, pad), (0, cin_p - cin)))
    x_flat = xp.reshape(n, hp * wp, cin_p).astype(COMPUTE_DTYPE)

    # weight (Cout,Cin,K,K) -> (K,K,Cin_p,128) -> (K*K*Cin_p, 128): lane-dense Cout.
    w_t = jnp.transpose(weight, (2, 3, 1, 0))
    w_t = jnp.pad(w_t, ((0, 0), (0, 0), (0, cin_p - cin), (0, LANE - cout)))
    w_mat = w_t.reshape(k * k * cin_p, LANE).astype(COMPUTE_DTYPE)
    b_mat = jnp.pad(bias.reshape(1, cout), ((0, 0), (0, LANE - cout))).astype(jnp.float32)

    kernel = functools.partial(_conv_taps_kernel, k=k, cin_p=cin_p, wp=wp,
                               m_wide=m_wide, relu=relu)

    out = pl.pallas_call(
        kernel,
        out_shape=jax.ShapeDtypeStruct((n, m_wide, LANE), jnp.float32),
        grid_spec=pltpu.PrefetchScalarGridSpec(
            num_scalar_prefetch=0,
            grid=(n,),                    # one image per step; N>=2 feeds both v7x TCs
            in_specs=[
                pl.BlockSpec((1, hp * wp, cin_p), lambda i: (i, 0, 0)),
                # constant block index -> weight / bias DMA'd once, kept resident
                pl.BlockSpec((k * k * cin_p, LANE), lambda i: (0, 0)),
                pl.BlockSpec((1, LANE), lambda i: (0, 0)),
            ],
            out_specs=pl.BlockSpec((1, m_wide, LANE), lambda i: (i, 0, 0)),
        ),
        compiler_params=pltpu.CompilerParams(
            dimension_semantics=("parallel",),
            # ~0.5 MiB/step at these sizes; explicit cap keeps headroom vs v7x's
            # 64 MiB physical VMEM while raising v5e's 16 MiB scoped default.
            vmem_limit_bytes=32 * 1024 * 1024,
        ),
    )(x_flat, w_mat, b_mat)

    # (N, M_wide, 128) -> (N, OH, s*Wp, 128); valid columns at j*s, channels [:Cout].
    out = out.reshape(n, oh, stride * wp, LANE)[:, :, 0:ow * stride:stride, :cout]
    return jnp.transpose(out, (0, 3, 1, 2))      # NHWC -> NCHW (module contract)


# ---------------- module-level compositions (runnable pieces of Generator) ----------------

def basic_cov(x, weight, bias, *, stride):
    """BasicCov: ReLU(Conv2d(x, kernel_size=k, stride, padding=k//2))."""
    return conv2d_pallas(x, weight, bias, stride=stride, relu=True)


def pre_solu(x, p):
    """Pre_solu: BasicCov(Cin->Cout, 3, 1) followed by Conv2d(Cout->Cout, 3, 1, 1)."""
    x = basic_cov(x, p["conv1_w"], p["conv1_b"], stride=1)
    x = conv2d_pallas(x, p["conv2_w"], p["conv2_b"], stride=1, relu=False)
    return x

# TODO(synk): the full Generator / Color_encoder forward is not constructible as specified (Color_encoder.conv1 emits C_out channels but conv2 expects 2*C_out, and the stride-2 ConvTranspose2d output of size 2H'-1 cannot be concatenated with the H-sized pre_solu branch), so only its runnable conv / concat building blocks are implemented.
# TODO(synk): nn.ConvTranspose2d (Color_encoder.deconv) has no Pallas implementation here since no runnable path of the reference module reaches it.


# ---------------- reference + self-test ----------------

def _conv_ref(x, weight, bias, *, stride, relu):
    k = weight.shape[-1]
    pad = k // 2
    y = lax.conv_general_dilated(
        x, weight, window_strides=(stride, stride),
        padding=((pad, pad), (pad, pad)),
        dimension_numbers=("NCHW", "OIHW", "NCHW"))
    y = y + bias.reshape(1, -1, 1, 1)
    return jnp.maximum(y, 0.0) if relu else y


if __name__ == "__main__":
    N, CIN, H, W = 2, 4, 16, 16
    COUT = 8

    key = jax.random.PRNGKey(0)
    ks = jax.random.split(key, 8)

    def uinit(kk, shape, fan_in):
        b = 1.0 / np.sqrt(fan_in)
        return jax.random.uniform(kk, shape, jnp.float32, -b, b)

    x = jax.random.normal(ks[0], (N, CIN, H, W), dtype=jnp.float32)

    # 1) BasicCov(4, 8, 3, 1): the core Conv2d+ReLU block used throughout the Generator.
    w1 = uinit(ks[1], (COUT, CIN, 3, 3), CIN * 9)
    b1 = uinit(ks[2], (COUT,), CIN * 9)
    y1 = jax.block_until_ready(basic_cov(x, w1, b1, stride=1))
    np.testing.assert_allclose(np.asarray(y1),
                               np.asarray(_conv_ref(x, w1, b1, stride=1, relu=True)),
                               rtol=3e-2, atol=3e-2)
    assert y1.shape == (N, COUT, H, W)

    # 2) Pre_solu(4, 8): BasicCov(4->8, 3, 1) then Conv2d(8->8, 3, 1, 1) (no ReLU).
    w2 = uinit(ks[3], (COUT, COUT, 3, 3), COUT * 9)
    b2 = uinit(ks[4], (COUT,), COUT * 9)
    params = {"conv1_w": w1, "conv1_b": b1, "conv2_w": w2, "conv2_b": b2}
    y2 = jax.block_until_ready(pre_solu(x, params))
    r2 = _conv_ref(_conv_ref(x, w1, b1, stride=1, relu=True), w2, b2, stride=1, relu=False)
    np.testing.assert_allclose(np.asarray(y2), np.asarray(r2), rtol=3e-2, atol=3e-2)
    assert y2.shape == (N, COUT, H, W)

    # 3) Color_encoder front end: cat([input, color], dim=1) -> BasicCov(CIN+1, COUT, 5, 2).
    colorpanel = 0.5
    color = jnp.full((N, 1, H, W), (colorpanel + 2.0) / 4.0, dtype=jnp.float32)
    xc = jnp.concatenate([x, color], axis=1)
    w3 = uinit(ks[5], (COUT, CIN + 1, 5, 5), (CIN + 1) * 25)
    b3 = uinit(ks[6], (COUT,), (CIN + 1) * 25)
    y3 = jax.block_until_ready(basic_cov(xc, w3, b3, stride=2))
    np.testing.assert_allclose(np.asarray(y3),
                               np.asarray(_conv_ref(xc, w3, b3, stride=2, relu=True)),
                               rtol=3e-2, atol=3e-2)
    assert y3.shape == (N, COUT, H // 2, W // 2)

    print("KERNEL_OK")
</pallas_src>

<mosaic_0001>
module attributes {stable_mosaic.version = 11 : i64} {
  func.func @_conv_taps_kernel(%arg0: i32, %arg1: memref<1x342x8xbf16, #tpu.memory_space<vmem>>, %arg2: memref<72x128xbf16, #tpu.memory_space<vmem>>, %arg3: memref<1x128xf32, #tpu.memory_space<vmem>>, %arg4: memref<1x288x128xf32, #tpu.memory_space<vmem>>) attributes {dimension_semantics = [#tpu.dimension_semantics<parallel>], iteration_bounds = array<i64: 2>, scalar_prefetch = 0 : i64, scratch_operands = 0 : i64, tpu.core_type = #tpu.core_type<tc>, window_params = [{transform_indices = @transform_0, window_bounds = array<i64: 1, 342, 8>}, {pipeline_mode = #tpu.pipeline_mode<synchronous>, transform_indices = @transform_1, window_bounds = array<i64: 72, 128>}, {pipeline_mode = #tpu.pipeline_mode<synchronous>, transform_indices = @transform_2, window_bounds = array<i64: 1, 128>}, {transform_indices = @transform_3, window_bounds = array<i64: 1, 288, 128>}]} {
    %cst = arith.constant 0.000000e+00 : f32
    %0 = vector.broadcast %cst : f32 to vector<288x128xf32>
    %c0 = arith.constant 0 : index
    %c0_0 = arith.constant 0 : index
    %c0_1 = arith.constant 0 : index
    %1 = vector.load %arg1[%c0, %c0_0, %c0_1] : memref<1x342x8xbf16, #tpu.memory_space<vmem>>, vector<1x288x8xbf16>
    %2 = vector.shape_cast %1 : vector<1x288x8xbf16> to vector<288x8xbf16>
    %c0_2 = arith.constant 0 : index
    %c0_3 = arith.constant 0 : index
    %3 = vector.load %arg2[%c0_2, %c0_3] : memref<72x128xbf16, #tpu.memory_space<vmem>>, vector<8x128xbf16>
    %cst_4 = arith.constant dense<0.000000e+00> : vector<288x128xf32>
    %4 = tpu.matmul %2, %3, %cst_4 {dimension_numbers = #tpu.dot_dimension_numbers<[1], [0], [0], [1], [0, 0, 1, 1], [], []>} : vector<288x8xbf16>, vector<8x128xbf16>, vector<288x128xf32> -> vector<288x128xf32>
    %5 = arith.addf %0, %4 : vector<288x128xf32>
    %c0_5 = arith.constant 0 : index
    %c1 = arith.constant 1 : index
    %c0_6 = arith.constant 0 : index
    %6 = vector.load %arg1[%c0_5, %c1, %c0_6] : memref<1x342x8xbf16, #tpu.memory_space<vmem>>, vector<1x288x8xbf16>
    %7 = vector.shape_cast %6 : vector<1x288x8xbf16> to vector<288x8xbf16>
    %c8 = arith.constant 8 : index
    %c0_7 = arith.constant 0 : index
    %8 = vector.load %arg2[%c8, %c0_7] : memref<72x128xbf16, #tpu.memory_space<vmem>>, vector<8x128xbf16>
    %cst_8 = arith.constant dense<0.000000e+00> : vector<288x128xf32>
    %9 = tpu.matmul %7, %8, %cst_8 {dimension_numbers = #tpu.dot_dimension_numbers<[1], [0], [0], [1], [0, 0, 1, 1], [], []>} : vector<288x8xbf16>, vector<8x128xbf16>, vector<288x128xf32> -> vector<288x128xf32>
    %10 = arith.addf %5, %9 : vector<288x128xf32>
    %c0_9 = arith.constant 0 : index
    %c2 = arith.constant 2 : index
    %c0_10 = arith.constant 0 : index
    %11 = vector.load %arg1[%c0_9, %c2, %c0_10] : memref<1x342x8xbf16, #tpu.memory_space<vmem>>, vector<1x288x8xbf16>
    %12 = vector.shape_cast %11 : vector<1x288x8xbf16> to vector<288x8xbf16>
    %c16 = arith.constant 16 : index
    %c0_11 = arith.constant 0 : index
    %13 = vector.load %arg2[%c16, %c0_11] : memref<72x128xbf16, #tpu.memory_space<vmem>>, vector<8x128xbf16>
    %cst_12 = arith.constant dense<0.000000e+00> : vector<288x128xf32>
    %14 = tpu.matmul %12, %13, %cst_12 {dimension_numbers = #tpu.dot_dimension_numbers<[1], [0], [0], [1], [0, 0, 1, 1], [], []>} : vector<288x8xbf16>, vector<8x128xbf16>, vector<288x128xf32> -> vector<288x128xf32>
    %15 = arith.addf %10, %14 : vector<288x128xf32>
    %c0_13 = arith.constant 0 : index
    %c18 = arith.constant 18 : index
    %c0_14 = arith.constant 0 : index
    %16 = vector.load %arg1[%c0_13, %c18, %c0_14] : memref<1x342x8xbf16, #tpu.memory_space<vmem>>, vector<1x288x8xbf16>
    %17 = vector.shape_cast %16 : vector<1x288x8xbf16> to vector<288x8xbf16>
    %c24 = arith.constant 24 : index
    %c0_15 = arith.constant 0 : index
    %18 = vector.load %arg2[%c24, %c0_15] : memref<72x128xbf16, #tpu.memory_space<vmem>>, vector<8x128xbf16>
    %cst_16 = arith.constant dense<0.000000e+00> : vector<288x128xf32>
    %19 = tpu.matmul %17, %18, %cst_16 {dimension_numbers = #tpu.dot_dimension_numbers<[1], [0], [0], [1], [0, 0, 1, 1], [], []>} : vector<288x8xbf16>, vector<8x128xbf16>, vector<288x128xf32> -> vector<288x128xf32>
    %20 = arith.addf %15, %19 : vector<288x128xf32>
    %c0_17 = arith.constant 0 : index
    %c19 = arith.constant 19 : index
    %c0_18 = arith.constant 0 : index
    %21 = vector.load %arg1[%c0_17, %c19, %c0_18] : memref<1x342x8xbf16, #tpu.memory_space<vmem>>, vector<1x288x8xbf16>
    %22 = vector.shape_cast %21 : vector<1x288x8xbf16> to vector<288x8xbf16>
    %c32 = arith.constant 32 : index
    %c0_19 = arith.constant 0 : index
    %23 = vector.load %arg2[%c32, %c0_19] : memref<72x128xbf16, #tpu.memory_space<vmem>>, vector<8x128xbf16>
    %cst_20 = arith.constant dense<0.000000e+00> : vector<288x128xf32>
    %24 = tpu.matmul %22, %23, %cst_20 {dimension_numbers = #tpu.dot_dimension_numbers<[1], [0], [0], [1], [0, 0, 1, 1], [], []>} : vector<288x8xbf16>, vector<8x128xbf16>, vector<288x128xf32> -> vector<288x128xf32>
    %25 = arith.addf %20, %24 : vector<288x128xf32>
    %c0_21 = arith.constant 0 : index
    %c20 = arith.constant 20 : index
    %c0_22 = arith.constant 0 : index
    %26 = vector.load %arg1[%c0_21, %c20, %c0_22] : memref<1x342x8xbf16, #tpu.memory_space<vmem>>, vector<1x288x8xbf16>
    %27 = vector.shape_cast %26 : vector<1x288x8xbf16> to vector<288x8xbf16>
    %c40 = arith.constant 40 : index
    %c0_23 = arith.constant 0 : index
    %28 = vector.load %arg2[%c40, %c0_23] : memref<72x128xbf16, #tpu.memory_space<vmem>>, vector<8x128xbf16>
    %cst_24 = arith.constant dense<0.000000e+00> : vector<288x128xf32>
    %29 = tpu.matmul %27, %28, %cst_24 {dimension_numbers = #tpu.dot_dimension_numbers<[1], [0], [0], [1], [0, 0, 1, 1], [], []>} : vector<288x8xbf16>, vector<8x128xbf16>, vector<288x128xf32> -> vector<288x128xf32>
    %30 = arith.addf %25, %29 : vector<288x128xf32>
    %c0_25 = arith.constant 0 : index
    %c36 = arith.constant 36 : index
    %c0_26 = arith.constant 0 : index
    %31 = vector.load %arg1[%c0_25, %c36, %c0_26] : memref<1x342x8xbf16, #tpu.memory_space<vmem>>, vector<1x288x8xbf16>
    %32 = vector.shape_cast %31 : vector<1x288x8xbf16> to vector<288x8xbf16>
    %c48 = arith.constant 48 : index
    %c0_27 = arith.constant 0 : index
    %33 = vector.load %arg2[%c48, %c0_27] : memref<72x128xbf16, #tpu.memory_space<vmem>>, vector<8x128xbf16>
    %cst_28 = arith.constant dense<0.000000e+00> : vector<288x128xf32>
    %34 = tpu.matmul %32, %33, %cst_28 {dimension_numbers = #tpu.dot_dimension_numbers<[1], [0], [0], [1], [0, 0, 1, 1], [], []>} : vector<288x8xbf16>, vector<8x128xbf16>, vector<288x128xf32> -> vector<288x128xf32>
    %35 = arith.addf %30, %34 : vector<288x128xf32>
    %c0_29 = arith.constant 0 : index
    %c37 = arith.constant 37 : index
    %c0_30 = arith.constant 0 : index
    %36 = vector.load %arg1[%c0_29, %c37, %c0_30] : memref<1x342x8xbf16, #tpu.memory_space<vmem>>, vector<1x288x8xbf16>
    %37 = vector.shape_cast %36 : vector<1x288x8xbf16> to vector<288x8xbf16>
    %c56 = arith.constant 56 : index
    %c0_31 = arith.constant 0 : index
    %38 = vector.load %arg2[%c56, %c0_31] : memref<72x128xbf16, #tpu.memory_space<vmem>>, vector<8x128xbf16>
    %cst_32 = arith.constant dense<0.000000e+00> : vector<288x128xf32>
    %39 = tpu.matmul %37, %38, %cst_32 {dimension_numbers = #tpu.dot_dimension_numbers<[1], [0], [0], [1], [0, 0, 1, 1], [], []>} : vector<288x8xbf16>, vector<8x128xbf16>, vector<288x128xf32> -> vector<288x128xf32>
    %40 = arith.addf %35, %39 : vector<288x128xf32>
    %c0_33 = arith.constant 0 : index
    %c38 = arith.constant 38 : index
    %c0_34 = arith.constant 0 : index
    %41 = vector.load %arg1[%c0_33, %c38, %c0_34] : memref<1x342x8xbf16, #tpu.memory_space<vmem>>, vector<1x288x8xbf16>
    %42 = vector.shape_cast %41 : vector<1x288x8xbf16> to vector<288x8xbf16>
    %c64 = arith.constant 64 : index
    %c0_35 = arith.constant 0 : index
    %43 = vector.load %arg2[%c64, %c0_35] : memref<72x128xbf16, #tpu.memory_space<vmem>>, vector<8x128xbf16>
    %cst_36 = arith.constant dense<0.000000e+00> : vector<288x128xf32>
    %44 = tpu.matmul %42, %43, %cst_36 {dimension_numbers = #tpu.dot_dimension_numbers<[1], [0], [0], [1], [0, 0, 1, 1], [], []>} : vector<288x8xbf16>, vector<8x128xbf16>, vector<288x128xf32> -> vector<288x128xf32>
    %45 = arith.addf %40, %44 : vector<288x128xf32>
    %c0_37 = arith.constant 0 : index
    %c0_38 = arith.constant 0 : index
    %46 = vector.load %arg3[%c0_37, %c0_38] : memref<1x128xf32, #tpu.memory_space<vmem>>, vector<1x128xf32>
    %47 = vector.broadcast %46 : vector<1x128xf32> to vector<288x128xf32>
    %48 = arith.addf %45, %47 : vector<288x128xf32>
    %cst_39 = arith.constant 0.000000e+00 : f32
    %49 = vector.broadcast %cst_39 : f32 to vector<288x128xf32>
    %50 = arith.maximumf %48, %49 : vector<288x128xf32>
    %c0_40 = arith.constant 0 : index
    %c0_41 = arith.constant 0 : index
    %c0_42 = arith.constant 0 : index
    %51 = vector.load %arg4[%c0_40, %c0_41, %c0_42] : memref<1x288x128xf32, #tpu.memory_space<vmem>>, vector<1x288x128xf32>
    %52 = vector.shape_cast %51 : vector<1x288x128xf32> to vector<288x128xf32>
    %53 = vector.shape_cast %50 : vector<288x128xf32> to vector<1x288x128xf32>
    tpu.vector_store %arg4[%c0_40, %c0_41, %c0_42], %53 {strides = array<i32>} : memref<1x288x128xf32, #tpu.memory_space<vmem>>, vector<1x288x128xf32>,
    return
  }
  func.func @transform_0(%arg0: i32) -> (i32, i32, i32) {
    %c0_i32 = arith.constant 0 : i32
    %c0_i32_0 = arith.constant 0 : i32
    %c0_i32_1 = arith.constant 0 : i32
    return %arg0, %c0_i32, %c0_i32_0 : i32, i32, i32
  }
  func.func @transform_1(%arg0: i32) -> (i32, i32) {
    %c0_i32 = arith.constant 0 : i32
    %c0_i32_0 = arith.constant 0 : i32
    %c0_i32_1 = arith.constant 0 : i32
    return %c0_i32, %c0_i32_0 : i32, i32
  }
  func.func @transform_2(%arg0: i32) -> (i32, i32) {
    %c0_i32 = arith.constant 0 : i32
    %c0_i32_0 = arith.constant 0 : i32
    %c0_i32_1 = arith.constant 0 : i32
    return %c0_i32, %c0_i32_0 : i32, i32
  }
  func.func @transform_3(%arg0: i32) -> (i32, i32, i32) {
    %c0_i32 = arith.constant 0 : i32
    %c0_i32_0 = arith.constant 0 : i32
    %c0_i32_1 = arith.constant 0 : i32
    return %arg0, %c0_i32, %c0_i32_0 : i32, i32, i32
  }
}

</mosaic_0001>

<bundles_post_ra>
// kernel: conv2d_pallas.1
= control target key start
LH: loop header
LB: loop body
LE: loop exit
PB: predicated region body
PF: predicated region fallthrough
CT: control target
= control target key end

     0   :  { %s4940_s12 = smov 0   ;;  %s5864_s0 = inlined_call_operand.vmem [shape: bf16[2,342,8], index: 0, kind: input, shape index: {}]   ;;  %s5865_s1 = inlined_call_operand.vmem [shape: bf16[72,128], index: 1, kind: input, shape index: {}]   ;;  %s5866_s2 = inlined_call_operand.vmem [shape: f32[1,128], index: 2, kind: input, shape index: {}]   ;;  %s5867_s3 = inlined_call_operand.vmem [shape: f32[2,288,128], index: 3, kind: output, shape index: {}]  }
   0x1 LB: > { %s3782_s13 = sadd.s32 4294967295, %s4918_s12   ;;  %p3786_p0 = scmp.ge.s32.totalorder %s4918_s12, 1  ;;  %s4918_s12 = sphi %s4940_s12, %s13_s12  }
   0x2   : > { %p137_p1 = scmp.lt.s32.totalorder %s4918_s12, 3 }
   0x4   : > { %p138_p2 = pnand %p3786_p0, %p137_p1 }
   0x5   : > { %vm508_vm0 = vcmask (!%p138_p2), 1043456   ;;  %v1657_v0 = vld [vmem:[%s5865_s1 + $0x10] sm:$0xf] (!%p138_p2)  ;;  %v210_v1 = vld [vmem:[%s5865_s1 + $0x4] sm:$0xf] (!%p138_p2)  ;;  %p161_p3 = scmp.lt.s32.totalorder (!%p138_p2), %s3782_s13, 1 }
   0x6   : > { %141 = sbr.rel (%p138_p2) target bundleno = 573 (0x23d), region = 32  ;;  %4823 = vmatprep.subr.msk.bf16.mxu0 (!%p138_p2), %vm508_vm0, %v1657_v0  ;;  %4819 = vmatprep.subr.msk.bf16.mxu1 (!%p138_p2), %vm508_vm0, %v210_v1  ;;  %v4957_v2 = vsel (!%p138_p2), %vm508_vm0, %v1657_v0, 0  ;;  %v510_v3 = vsel (!%p138_p2), %vm508_vm0, %v210_v1, 0  ;;  %v2103_v4 = vld [vmem:[%s5865_s1 + $0x14] sm:$0xf] (!%p138_p2)  ;;  %vm453_vm2 = vcmask (!%p138_p2), 64512  }
   0x7   : > { %4340 = vmatpush3.bf16.msra.mxu0 (!%p138_p2), %v4957_v2  ;;  %4188 = vmatpush3.bf16.msra.mxu1 (!%p138_p2), %v510_v3  ;;  %v208_v5 = vld [vmem:[%s5865_s1] sm:$0xf] (!%p138_p2)  ;;  %vm304_vm1 = vsmask.f32 (!%p138_p2), 7424  ;;  %v4978_v6 = vsel (!%p138_p2), %vm508_vm0, %v2103_v4, 0  ;;  %vm2107_vm4 = vcmask (!%p138_p2), 1045504  }
   0x8   : > { %4825 = vmatprep.subr.msk.bf16.mxu0 (!%p138_p2), %vm508_vm0, %v2103_v4  ;;  %4820 = vmatprep.subr.msk.bf16.mxu1 (!%p138_p2), %vm508_vm0, %v208_v5  ;;  %vm1661_vm3 = vsmask.f32 (!%p138_p2), 6400  ;;  %v726_v12 = vsel (!%p138_p2), %vm508_vm0, %v208_v5, 0  ;;  %v5026_v39 = vld [vmem:[%s5865_s1 + $0x8] sm:$0xf] (!%p138_p2)  ;;  %vm910_vm5 = vcmask (!%p138_p2), 1046528  }
   0x9   : > { %v5060_v1 = vld [vmem:[%s5865_s1 + $0x18] sm:$0xf] (!%p138_p2)  ;;  %vm2858_vm6 = vsmask.f32 (!%p138_p2), 5376  ;;  %vm3304_vm7 = vcmask (!%p138_p2), 1044480  }
   0xd   : > { %s5869_s13 = smov (!%p161_p3, %s3782_s13), 1 }
   0xe   : > { %s4829_s22 = smul.u32 172, %s5869_s13 }
   0xf   : > { %s4830_s11 = smul.u32 288, %s5869_s13 }
  0x10   : > { %s4975_s25 = scalar_lea.vmem %s5864_s0, %s4829_s22 }
  0x11   : > { %v172_v7 = vld [vmem:[%s4975_s25] sm:$0xf]  ;;  %v4982_v8 = vld [vmem:[%s4975_s25 + $0x4] sm:$0xf]  ;;  %v4988_v10 = vld [vmem:[%s4975_s25 + $0x8] sm:$0xff]   ;;  %s5780_s18 = scalar_lea.vmem %s5867_s3, %s4830_s11 }
  0x12   : > { %v4985_v9 = vcombine.low %v172_v7, %v4982_v8  ;;  %v1218_v11 = vld [vmem:[%s4975_s25 + $0x8] sm:$0xe]  ;;  %v4993_v13 = vld [vmem:[%s4975_s25 + $0xc] sm:$0xf]  ;;  %v313_v16 = vshll.u32 %v4988_v10, 16  ;;  %v317_v17 = vshrl.u32 %v4988_v10, 16 }
  0x13   : > { %v5000_v18 = vld [vmem:[%s4975_s25 + $0x10] sm:$0xff]   ;;  %v5006_v20 = vcombine.low %v1218_v11, %v4993_v13  ;;  %v5014_v28 = vld [vmem:[%s4975_s25 + $0x18] sm:$0xff]   ;;  %v5020_v34 = vld [vmem:[%s4975_s25 + $0x20] sm:$0xff]  }
  0x14   : > { %v306_v14 = vshrl.u32 %v4985_v9, 16  ;;  %v308_v15 = vshll.u32 %v4985_v9, 16  ;;  %v5003_v19 = vld [vmem:[%s4975_s25 + $0x10] sm:$0xff]   ;;  %v315_v22 = vrot.slane %v313_v16, 1  ;;  %v1671_v23 = vshrl.u32 %v5000_v18, 16  ;;  %v5017_v33 = vld [vmem:[%s4975_s25 + $0x18] sm:$0xff]  }
  0x15   : > { %v1674_v24 = vshll.u32 %v5000_v18, 16  ;;  %v1663_v25 = vshrl.u32 %v5006_v20, 16  ;;  %v1666_v26 = vshll.u32 %v5006_v20, 16  ;;  %v321_v27 = vshll.u32 %v5003_v19, 16  ;;  %v5035_v48 = vld [vmem:[%s4975_s25 + $0x20] sm:$0xff]   ;;  %v5038_v49 = vld [vmem:[%s4975_s25 + $0x28] sm:$0xff]  }
  0x16   : > { %v310_v21 = vrot.slane %v308_v15, 1  ;;  %v319_v30 = vor.u32 %v317_v17, %v315_v22  ;;  %v1673_v31 = vrot.slane %v1671_v23, 1  ;;  %v1680_v38 = vshrl.u32 %v5014_v28, 16  ;;  %v5044_v54 = vld [vmem:[%s4975_s25 + $0x28] sm:$0xff]   ;;  %v5050_v59 = vld [vmem:[%s4975_s25 + $0x30] sm:$0xff]   ;;  %v5074_v23 = vld [vmem:[%s4975_s25 + $0x38] sm:$0xff]  }
  0x17   : > { %v1676_v32 = vrot.slane %v1674_v24, 2  ;;  %v1665_v35 = vrot.slane %v1663_v25, 1  ;;  %v1668_v36 = vrot.slane %v1666_v26, 2  ;;  %v323_v37 = vrot.slane %v321_v27, 1  ;;  %v5055_v0 = vld [vmem:[%s4975_s25 + $0x30] sm:$0xff]  }
  0x18   : > { %v311_v29 = vor.u32 %v310_v21, %v306_v14  ;;  %v1683_v42 = vshll.u32 %v5014_v28, 16  ;;  %v325_v43 = vshrl.u32 %v5003_v19, 16  ;;  %v1682_v46 = vrot.slane %v1680_v38, 1 }
  0x19   : > { %v1677_v41 = vor.u32 %v1676_v32, %v1673_v31  ;;  %v1669_v44 = vor.u32 %v1668_v36, %v1665_v35  ;;  %v324_v45 = vsel %vm304_vm1, %v319_v30, %v323_v37  ;;  %v329_v47 = vshll.u32 %v5017_v33, 16  ;;  %v5083_v35 = vld [vmem:[%s4975_s25 + $0x38] sm:$0xff]  }
  0x1a   : > { %v316_v40 = vsel %vm304_vm1, %v311_v29, %v315_v22  ;;  %v1685_v50 = vrot.slane %v1683_v42, 2  ;;  %v327_v51 = vor.u32 %v325_v43, %v323_v37  ;;  %v1689_v52 = vshrl.u32 %v5020_v34, 16 }
  0x1b   : > { %4189 = vmatprep.mubr.msk.bf16.mxu1 %vm453_vm2, %v316_v40  ;;  %v1692_v53 = vshll.u32 %v5020_v34, 16  ;;  %v1678_v55 = vsel %vm1661_vm3, %v1669_v44, %v1677_v41  ;;  %v331_v56 = vrot.slane %v329_v47, 1  ;;  %v333_v57 = vshrl.u32 %v5017_v33, 16  ;;  %v5094_v44 = vld [vmem:[%s4975_s25 + $0x40] sm:$0xff]  }
  0x1c   : > { %4190 = vmatmul.mubr.msk.bf16.vlgmr.msra.gmra.mrb[0].mxu1 %vm453_vm2, %v324_v45  ;;  %v337_v58 = vshll.u32 %v5035_v48, 16  ;;  %4341 = vmatprep.mubr.msk.bf16.mxu0 %vm453_vm2, %v1678_v55  ;;  %v1686_v60 = vor.u32 %v1685_v50, %v1682_v46  ;;  %v1691_v61 = vrot.slane %v1689_v52, 1  ;;  %v1698_v63 = vshrl.u32 %v5038_v49, 16 }
  0x1d   : > { %4226 = vmatpush3.bf16.msra.mxu1 %v726_v12  ;;  %v1694_v62 = vrot.slane %v1692_v53, 2  ;;  %v332_v3 = vsel %vm304_vm1, %v327_v51, %v331_v56  ;;  %v335_v4 = vor.u32 %v333_v57, %v331_v56  ;;  %v1701_v7 = vshll.u32 %v5038_v49, 16  ;;  %v5099_v51 = vld [vmem:[%s4975_s25 + $0x40] sm:$0xff]  }
  0x1e   : > { %4821 = vmatprep.subr.msk.bf16.mxu1 %vm508_vm0, %v5026_v39  ;;  %v339_v5 = vrot.slane %v337_v58, 1  ;;  %v1687_v11 = vsel %vm1661_vm3, %v1677_v41, %v1686_v60  ;;  %4193 = vmatprep.mubr.msk.bf16.mxu1 %vm453_vm2, %v332_v3  ;;  %v1700_v14 = vrot.slane %v1698_v63, 1  ;;  %v341_v15 = vshrl.u32 %v5035_v48, 16  ;;  %v5110_v63 = vld [vmem:[%s4975_s25 + $0x48] sm:$0xff]  }
  0x1f   : > { %v1695_v12 = vor.u32 %v1694_v62, %v1691_v61  ;;  %4342 = vmatmul.mubr.msk.bf16.vlgmr.msra.gmra.mrb[0].mxu0 %vm453_vm2, %v1687_v11  ;;  %v1703_v17 = vrot.slane %v1701_v7, 2  ;;  %v345_v21 = vshll.u32 %v5044_v54, 16  ;;  %v1707_v22 = vshrl.u32 %v5050_v59, 16  ;;  %v5107_v62 = vld [vmem:[%s4975_s25 + $0x48] sm:$0xff]  }
  0x20   : > { %v340_v16 = vsel %vm304_vm1, %v335_v4, %v339_v5  ;;  %4378 = vmatpush3.bf16.msra.mxu0 %v4978_v6  ;;  %v343_v25 = vor.u32 %v341_v15, %v339_v5  ;;  %v1710_v26 = vshll.u32 %v5050_v59, 16  ;;  %v349_v27 = vshrl.u32 %v5044_v54, 16 }
  0x21   : > { %v1696_v24 = vsel %vm1661_vm3, %v1686_v60, %v1695_v12  ;;  %v1704_v29 = vor.u32 %v1703_v17, %v1700_v14  ;;  %v347_v30 = vrot.slane %v345_v21, 1  ;;  %v1709_v31 = vrot.slane %v1707_v22, 1  ;;  %4826 = vmatprep.subr.msk.bf16.mxu0 %vm508_vm0, %v5060_v1  ;;  %v5119_v14 = vld [vmem:[%s4975_s25 + $0x50] sm:$0xff]  }
  0x22   : > { %4345 = vmatprep.mubr.msk.bf16.mxu0 %vm453_vm2, %v1696_v24  ;;  %v353_v32 = vshll.u32 %v5055_v0, 16  ;;  %v1712_v6 = vrot.slane %v1710_v26, 2  ;;  %v1716_v36 = vshrl.u32 %v5074_v23, 16  ;;  %v1719_v37 = vshll.u32 %v5074_v23, 16 }
  0x23   : > { %v357_v38 = vshrl.u32 %v5055_v0, 16  ;;  %v1705_v40 = vsel %vm1661_vm3, %v1695_v12, %v1704_v29  ;;  %v348_v41 = vsel %vm304_vm1, %v343_v25, %v347_v30  ;;  %v351_v42 = vor.u32 %v349_v27, %v347_v30  ;;  %v5127_v25 = vld [vmem:[%s4975_s25 + $0x50] sm:$0xff]  }
  0x24   : > { %4194 = vmatmul.mubr.msk.bf16.gmra.mrb[4].mxu1 %vm453_vm2, %v340_v16  ;;  %v355_v43 = vrot.slane %v353_v32, 1  ;;  %v1713_v45 = vor.u32 %v1712_v6, %v1709_v31  ;;  %v1718_v46 = vrot.slane %v1716_v36, 1  ;;  %v1721_v47 = vrot.slane %v1719_v37, 2 }
  0x25   : > { %4197 = vmatprep.mubr.msk.bf16.mxu1 %vm453_vm2, %v348_v41  ;;  %v361_v50 = vshll.u32 %v5083_v35, 16  ;;  %v1725_v55 = vshrl.u32 %v5094_v44, 16  ;;  %v1728_v56 = vshll.u32 %v5094_v44, 16  ;;  %v365_v61 = vshrl.u32 %v5083_v35, 16  ;;  %v5137_v41 = vld [vmem:[%s4975_s25 + $0x58] sm:$0xff]  }
  0x26   : > { %v356_v52 = vsel %vm304_vm1, %v351_v42, %v355_v43  ;;  %v359_v53 = vor.u32 %v357_v38, %v355_v43  ;;  %v1714_v57 = vsel %vm1661_vm3, %v1704_v29, %v1713_v45  ;;  %v1722_v58 = vor.u32 %v1721_v47, %v1718_v46  ;;  %v5132_v29 = vld [vmem:[%s4975_s25 + $0x58] sm:$0xff]  }
  0x27   : > { %v363_v60 = vrot.slane %v361_v50, 1  ;;  %4346 = vmatmul.mubr.msk.bf16.gmra.mrb[4].mxu0 %vm453_vm2, %v1705_v40  ;;  %v1727_v3 = vrot.slane %v1725_v55, 1  ;;  %v1730_v4 = vrot.slane %v1728_v56, 2  ;;  %v369_v5 = vshll.u32 %v5099_v51, 16 }
  0x28   : > { %v373_v7 = vshrl.u32 %v5099_v51, 16  ;;  %4349 = vmatprep.mubr.msk.bf16.mxu0 %vm453_vm2, %v1714_v57  ;;  %v1734_v12 = vshrl.u32 %v5107_v62, 16  ;;  %v1737_v16 = vshll.u32 %v5107_v62, 16  ;;  %v377_v17 = vshll.u32 %v5110_v63, 16  ;;  %v2102_v57 = vld [vmem:[%s4975_s25 + $0x8] sm:$0xc] }
  0x29   : > { %v364_v11 = vsel %vm304_vm1, %v359_v53, %v363_v60  ;;  %v1731_v15 = vor.u32 %v1730_v4, %v1727_v3  ;;  %v371_v21 = vrot.slane %v369_v5, 1  ;;  %v1743_v22 = vshrl.u32 %v5119_v14, 16 }
  0x2a   : > { %v1746_v24 = vshll.u32 %v5119_v14, 16  ;;  %v1723_v26 = vsel %vm1661_vm3, %v1713_v45, %v1722_v58  ;;  %v367_v27 = vor.u32 %v365_v61, %v363_v60  ;;  %v1736_v30 = vrot.slane %v1734_v12, 1 }
  0x2b   : > { %v1739_v31 = vrot.slane %v1737_v16, 2  ;;  %v375_v32 = vor.u32 %v373_v7, %v371_v21  ;;  %v379_v6 = vrot.slane %v377_v17, 1  ;;  %v1732_v36 = vsel %vm1661_vm3, %v1722_v58, %v1731_v15  ;;  %v5151_v58 = vld [vmem:[%s4975_s25 + $0x60] sm:$0xff]  }
  0x2c   : > { %4198 = vmatmul.mubr.msk.bf16.gmra.mrb[8].mxu1 %vm453_vm2, %v356_v52  ;;  %v1745_v37 = vrot.slane %v1743_v22, 1  ;;  %v1748_v38 = vrot.slane %v1746_v24, 2  ;;  %v385_v40 = vshll.u32 %v5127_v25, 16  ;;  %v372_v42 = vsel %vm304_vm1, %v367_v27, %v371_v21 }
  0x2d   : > { %4201 = vmatprep.mubr.msk.bf16.mxu1 %vm453_vm2, %v364_v11  ;;  %v381_v43 = vshrl.u32 %v5110_v63, 16  ;;  %v1752_v45 = vshrl.u32 %v5132_v29, 16  ;;  %v1755_v46 = vshll.u32 %v5132_v29, 16  ;;  %v1740_v47 = vor.u32 %v1739_v31, %v1736_v30  ;;  %v5156_v11 = vld [vmem:[%s4975_s25 + $0x68] sm:$0xff]  }
  0x2e   : > { %v380_v50 = vsel %vm304_vm1, %v375_v32, %v379_v6  ;;  %v389_v52 = vshrl.u32 %v5127_v25, 16  ;;  %v393_v53 = vshll.u32 %v5137_v41, 16  ;;  %v1749_v55 = vor.u32 %v1748_v38, %v1745_v37  ;;  %v5173_v32 = vld [vmem:[%s4975_s25 + $0x70] sm:$0xff]  }
  0x2f   : > { %4350 = vmatmul.mubr.msk.bf16.gmra.mrb[8].mxu0 %vm453_vm2, %v1723_v26  ;;  %v387_v56 = vrot.slane %v385_v40, 1  ;;  %v383_v60 = vor.u32 %v381_v43, %v379_v6  ;;  %v1754_v61 = vrot.slane %v1752_v45, 1  ;;  %v1757_v3 = vrot.slane %v1755_v46, 2  ;;  %v5179_v40 = vld [vmem:[%s4975_s25 + $0x78] sm:$0xff]  }
  0x30   : > { %4353 = vmatprep.mubr.msk.bf16.mxu0 %vm453_vm2, %v1732_v36  ;;  %v1741_v4 = vsel %vm1661_vm3, %v1731_v15, %v1740_v47  ;;  %v395_v7 = vrot.slane %v393_v53, 1  ;;  %v1750_v12 = vsel %vm1661_vm3, %v1740_v47, %v1749_v55  ;;  %v3919_v16 = vcombine.low %v2102_v57, %v4993_v13 }
  0x31   : > { %v391_v5 = vor.u32 %v389_v52, %v387_v56  ;;  %v401_v17 = vshll.u32 %v5151_v58, 16  ;;  %v388_v21 = vsel %vm304_vm1, %v383_v60, %v387_v56  ;;  %v397_v22 = vshrl.u32 %v5137_v41, 16  ;;  %v5194_v56 = vld [vmem:[%s4975_s25 + $0x80] sm:$0xff]  }
  0x32   : > { %v5165_v15 = vor.u32 %v1757_v3, %v1754_v61  ;;  %v405_v26 = vshrl.u32 %v5151_v58, 16  ;;  %v409_v27 = vshll.u32 %v5156_v11, 16  ;;  %v2108_v13 = vrot.slane %v3919_v16, 2 }
  0x33   : > { %v396_v24 = vsel %vm304_vm1, %v391_v5, %v395_v7  ;;  %v2109_v30 = vrot.slane %v5000_v18, 2  ;;  %v403_v31 = vrot.slane %v401_v17, 1  ;;  %v399_v6 = vor.u32 %v397_v22, %v395_v7 }
  0x34   : > { %4202 = vmatmul.mubr.msk.bf16.gmra.mrb[12].mxu1 %vm453_vm2, %v372_v42  ;;  %v1759_v36 = vsel %vm1661_vm3, %v1749_v55, %v5165_v15  ;;  %v411_v38 = vrot.slane %v409_v27, 1  ;;  %v417_v18 = vshll.u32 %v5173_v32, 16  ;;  %v2111_v45 = vrot.slane %v5014_v28, 2  ;;  %v5224_v27 = vld [vmem:[%s4975_s25 + $0x90] ss:$0 sps:$4 sm:$0x11]  }
  0x35   : > { %4205 = vmatprep.mubr.msk.bf16.mxu1 %vm453_vm2, %v380_v50  ;;  %v407_v37 = vor.u32 %v405_v26, %v403_v31  ;;  %v2110_v42 = vsel %vm2107_vm4, %v2108_v13, %v2109_v30  ;;  %v404_v43 = vsel %vm304_vm1, %v399_v6, %v403_v31  ;;  %v413_v46 = vshrl.u32 %v5156_v11, 16 }
  0x36   : > { %v421_v50 = vshrl.u32 %v5173_v32, 16  ;;  %v425_v52 = vshll.u32 %v5179_v40, 16  ;;  %v2113_v53 = vrot.slane %v5020_v34, 2  ;;  %v419_v55 = vrot.slane %v417_v18, 1  ;;  %v5207_v34 = vld [vmem:[%s5865_s1 + $0x1c] sm:$0xf] }
  0x37   : > { %4354 = vmatmul.mubr.msk.bf16.gmra.mrb[12].mxu0 %vm453_vm2, %v1741_v4  ;;  %v412_v47 = vsel %vm304_vm1, %v407_v37, %v411_v38  ;;  %v2638_v28 = vsel %vm508_vm0, %v5060_v1, 0  ;;  %v415_v57 = vor.u32 %v413_v46, %v411_v38  ;;  %v2112_v60 = vsel %vm2107_vm4, %v2109_v30, %v2111_v45  ;;  %v5201_v4 = vld [vmem:[%s4975_s25 + $0x88] sm:$0xff]  }
  0x38   : > { %4357 = vmatprep.mubr.msk.bf16.mxu0 %vm453_vm2, %v1750_v12  ;;  %v423_v61 = vor.u32 %v421_v50, %v419_v55  ;;  %v427_v3 = vrot.slane %v425_v52, 1  ;;  %v2114_v5 = vsel %vm2107_vm4, %v2111_v45, %v2113_v53  ;;  %v433_v7 = vshll.u32 %v5194_v56, 16 }
  0x39   : > { %v420_v1 = vsel %vm304_vm1, %v415_v57, %v419_v55  ;;  %v2115_v12 = vrot.slane %v5038_v49, 2  ;;  %v429_v16 = vshrl.u32 %v5179_v40, 16  ;;  %v441_v22 = vshll.u32 %v5201_v4, 16  ;;  %v5251_v55 = vld [vmem:[%s4975_s25 + $0x60] sm:$0xff]   ;;  %v5270_v57 = vld [vmem:[%s4975_s25 + $0x68] sm:$0xff]  }
  0x3a   : > { %v428_v17 = vsel %vm304_vm1, %v423_v61, %v427_v3  ;;  %v435_v26 = vrot.slane %v433_v7, 1  ;;  %v449_v37 = vshll.u32 %v5224_v27, 16  ;;  %v2119_v38 = vrot.slane %v5074_v23, 2  ;;  %v5288_v7 = vld [vmem:[%s4975_s25 + $0x78] sm:$0xff]  }
  0x3b   : > { %v431_v49 = vor.u32 %v429_v16, %v427_v3  ;;  %v2116_v13 = vsel %vm2107_vm4, %v2113_v53, %v2115_v12  ;;  %v443_v31 = vrot.slane %v441_v22, 1  ;;  %v2121_v18 = vrot.slane %v5094_v44, 2  ;;  %v5304_v22 = vld [vmem:[%s4975_s25 + $0x88] sm:$0xff]  }
  0x3c   : > { %4206 = vmatmul.mubr.msk.bf16.gmra.mrb[16].mxu1 %vm453_vm2, %v388_v21  ;;  %v437_v21 = vshrl.u32 %v5194_v56, 16  ;;  %v451_v45 = vrot.slane %v449_v37, 1  ;;  %v2123_v23 = vrot.slane %v5107_v62, 2  ;;  %v2125_v44 = vrot.slane %v5119_v14, 2 }
  0x3d   : > { %4209 = vmatprep.mubr.msk.bf16.mxu1 %vm453_vm2, %v396_v24  ;;  %v2117_v24 = vrot.slane %v5050_v59, 2  ;;  %v436_v59 = vsel %vm304_vm1, %v431_v49, %v435_v26  ;;  %v2127_v62 = vrot.slane %v5132_v29, 2  ;;  %v1003_v14 = vsel %vm508_vm0, %v5026_v39, 0 }
  0x3e   : > { %v439_v30 = vor.u32 %v437_v21, %v435_v26  ;;  %v2124_v52 = vsel %vm2107_vm4, %v2121_v18, %v2123_v23  ;;  %v2126_v53 = vsel %vm2107_vm4, %v2123_v23, %v2125_v44  ;;  %v2131_v61 = vrot.slane %v5270_v57, 2  ;;  %v5308_v26 = vld [vmem:[%s4975_s25 + $0x90] sm:$0xff]  }
  0x3f   : > { %4358 = vmatmul.mubr.msk.bf16.gmra.mrb[16].mxu0 %vm453_vm2, %v1759_v36  ;;  %v2118_v6 = vsel %vm2107_vm4, %v2115_v12, %v2117_v24  ;;  %v445_v36 = vshrl.u32 %v5201_v4, 16  ;;  %v2120_v46 = vsel %vm2107_vm4, %v2117_v24, %v2119_v38  ;;  %v2128_v29 = vsel %vm2107_vm4, %v2125_v44, %v2127_v62  ;;  %v5292_v12 = vld [vmem:[%s4975_s25 + $0x80] sm:$0xff]  }
  0x40   : > { %4379 = vmatprep.mubr.msk.bf16.mxu0 %vm453_vm2, %v2110_v42  ;;  %v444_v42 = vsel %vm304_vm1, %v439_v30, %v443_v31  ;;  %v2135_v16 = vrot.slane %v5288_v7, 2  ;;  %v2139_v49 = vrot.slane %v5304_v22, 2  ;;  %v2415_v30 = vld [vmem:[%s4975_s25 + $0x10] sm:$0xc] }
  0x44   : > { %4210 = vmatmul.mubr.msk.bf16.gmra.mrb[20].mxu1 %vm453_vm2, %v404_v43  ;;  %v447_v43 = vor.u32 %v445_v36, %v443_v31  ;;  %v5318_v31 = vld [vmem:[%s4975_s25 + $0x14] sm:$0xf] }
  0x45   : > { %4213 = vmatprep.mubr.msk.bf16.mxu1 %vm453_vm2, %v412_v47  ;;  %v2122_v47 = vsel %vm2107_vm4, %v2119_v38, %v2121_v18  ;;  %v5328_v37 = vcombine.low %v2415_v30, %v5318_v31  ;;  %v5331_v38 = vld [vmem:[%s4975_s25 + $0x18] sm:$0xff]  }
  0x46   : > { %v452_v50 = vsel %vm304_vm1, %v447_v43, %v451_v45  ;;  %v2547_v43 = vrot.slane %v5331_v38, 2 }
  0x47   : > { %4380 = vmatmul.mubr.msk.bf16.vlgmr.msra.gmra.mrb[0].mxu0 %vm453_vm2, %v2112_v60  ;;  %v5276_v60 = vld [vmem:[%s4975_s25 + $0x70] sm:$0xff]   ;;  %v2546_v18 = vrot.slane %v5328_v37, 2 }
  0x48   : > { %4416 = vmatpush3.bf16.msra.mxu0 %v2638_v28  ;;  %4383 = vmatprep.mubr.msk.bf16.mxu0 %vm453_vm2, %v2114_v5  ;;  %v2129_v28 = vrot.slane %v5251_v55, 2  ;;  %v2133_v3 = vrot.slane %v5276_v60, 2 }
  0x49   : > { %4827 = vmatprep.subr.msk.bf16.mxu0 %vm508_vm0, %v5207_v34 }
  0x4a   : > { %v2130_v39 = vsel %vm2107_vm4, %v2127_v62, %v2129_v28  ;;  %v2132_v5 = vsel %vm2107_vm4, %v2129_v28, %v2131_v61  ;;  %v2136_v21 = vsel %vm2107_vm4, %v2133_v3, %v2135_v16  ;;  %v3084_v62 = vsel %vm508_vm0, %v5207_v34, 0  ;;  %v5366_v28 = vld [vmem:[%s4975_s25 + $0x38] sm:$0xff]  }
  0x4c   : > { %4214 = vmatmul.mubr.msk.bf16.gmra.mrb[24].mxu1 %vm453_vm2, %v420_v1  ;;  %v2134_v1 = vsel %vm2107_vm4, %v2131_v61, %v2133_v3  ;;  %v2555_v61 = vrot.slane %v5366_v28, 2  ;;  %v5385_v3 = vld [vmem:[%s4975_s25 + $0x40] sm:$0xff]  }
  0x4d   : > { %4217 = vmatprep.mubr.msk.bf16.mxu1 %vm453_vm2, %v428_v17  ;;  %v2137_v17 = vrot.slane %v5292_v12, 2 }
  0x4f   : > { %4384 = vmatmul.mubr.msk.bf16.gmra.mrb[4].mxu0 %vm453_vm2, %v2116_v13  ;;  %v2138_v24 = vsel %vm2107_vm4, %v2135_v16, %v2137_v17  ;;  %v2141_v13 = vrot.slane %v5308_v26, 2  ;;  %v905_v16 = vld [vmem:[%s4975_s25] sm:$0xe] }
  0x50   : > { %4387 = vmatprep.mubr.msk.bf16.mxu0 %vm453_vm2, %v2118_v6  ;;  %v2140_v6 = vsel %vm2107_vm4, %v2137_v17, %v2139_v49  ;;  %v2557_v17 = vrot.slane %v5385_v3, 2 }
  0x51   : > { %v2142_v36 = vsel %vm2107_vm4, %v2139_v49, %v2141_v13 }
  0x52   : > { %v2558_v49 = vsel %vm2107_vm4, %v2555_v61, %v2557_v17 }
  0x54   : > { %4218 = vmatmul.mubr.msk.bf16.gmra.mrb[28].mxu1 %vm453_vm2, %v436_v59  ;;  %v5324_v59 = vld [vmem:[%s4975_s25 + $0x98] ss:$0 sps:$4 sm:$0x33]  }
  0x55   : > { %4221 = vmatprep.mubr.msk.bf16.mxu1 %vm453_vm2, %v444_v42  ;;  %v2143_v42 = vrot.slane %v5324_v59, 2 }
  0x57   : > { %4388 = vmatmul.mubr.msk.bf16.gmra.mrb[8].mxu0 %vm453_vm2, %v2120_v46  ;;  %v2144_v45 = vsel %vm2107_vm4, %v2141_v13, %v2143_v42  ;;  %v5344_v46 = vld [vmem:[%s4975_s25 + $0x20] sm:$0xff]   ;;  %v5403_v13 = vld [vmem:[%s4975_s25 + $0x50] sm:$0xff]  }
  0x58   : > { %4391 = vmatprep.mubr.msk.bf16.mxu0 %vm453_vm2, %v2122_v47  ;;  %v2548_v47 = vsel %vm2107_vm4, %v2546_v18, %v2547_v43  ;;  %v2549_v23 = vrot.slane %v5344_v46, 2  ;;  %v2561_v42 = vrot.slane %v5403_v13, 2 }
  0x5c   : > { %4222 = vmatmul.mubr.msk.bf16.gmra.mrb[32].mxu1 %vm453_vm2, %v452_v50  ;;  %v5348_v50 = vld [vmem:[%s4975_s25 + $0x28] sm:$0xff]  }
  0x5d   : > { %4227 = vmatprep.mubr.msk.bf16.mxu1 %vm453_vm2, %v4985_v9  ;;  %v5262_v9 = vld [vmem:[%s5865_s1 + $0xc] sm:$0xf]  ;;  %v2551_v44 = vrot.slane %v5348_v50, 2 }
  0x5f   : > { %4392 = vmatmul.mubr.msk.bf16.gmra.mrb[12].mxu0 %vm453_vm2, %v2124_v52  ;;  %v2550_v52 = vsel %vm2107_vm4, %v2547_v43, %v2549_v23 }
  0x60   : > { %4395 = vmatprep.mubr.msk.bf16.mxu0 %vm453_vm2, %v2126_v53  ;;  %v5360_v53 = vld [vmem:[%s4975_s25 + $0x30] sm:$0xff]  }
  0x64   : > { %4228 = vmatmul.mubr.msk.bf16.vlgmr.msra.gmra.mrb[0].mxu1 %vm453_vm2, %v4988_v10 }
  0x65   : > { %4231 = vmatprep.mubr.msk.bf16.mxu1 %vm453_vm2, %v5003_v19  ;;  %4264 = vmatpush3.bf16.msra.mxu1 %v1003_v14  ;;  %v2552_v14 = vsel %vm2107_vm4, %v2549_v23, %v2551_v44  ;;  %v916_v23 = vrot.slane %v5017_v33, 1 }
  0x66   : > { %4822 = vmatprep.subr.msk.bf16.mxu1 %vm508_vm0, %v5262_v9 }
  0x67   : > { %4396 = vmatmul.mubr.msk.bf16.gmra.mrb[16].mxu0 %vm453_vm2, %v2128_v29  ;;  %v5371_v29 = vld [vmem:[%s5865_s1 + $0x20] sm:$0xf] }
  0x68   : > { %4399 = vmatprep.mubr.msk.bf16.mxu0 %vm453_vm2, %v2130_v39  ;;  %v2553_v39 = vrot.slane %v5360_v53, 2 }
  0x6a   : > { %v2554_v34 = vsel %vm2107_vm4, %v2551_v44, %v2553_v39 }
  0x6c   : > { %4232 = vmatmul.mubr.msk.bf16.gmra.mrb[4].mxu1 %vm453_vm2, %v5017_v33 }
  0x6d   : > { %4235 = vmatprep.mubr.msk.bf16.mxu1 %vm453_vm2, %v5035_v48 }
  0x6f   : > { %4400 = vmatmul.mubr.msk.bf16.gmra.mrb[20].mxu0 %vm453_vm2, %v2132_v5  ;;  %v2556_v5 = vsel %vm2107_vm4, %v2553_v39, %v2555_v61  ;;  %v1441_v39 = vsel %vm508_vm0, %v5262_v9, 0  ;;  %v918_v61 = vrot.slane %v5035_v48, 1  ;;  %v4901_v9 = vld [vmem:[%s5865_s1 + $0x10] sm:$0xf] }
  0x70   : > { %4403 = vmatprep.mubr.msk.bf16.mxu0 %vm453_vm2, %v2134_v1  ;;  %v5389_v1 = vld [vmem:[%s4975_s25 + $0x48] sm:$0xff]  }
  0x71   : > { %v919_v48 = vsel %vm910_vm5, %v916_v23, %v918_v61 }
  0x74   : > { %4236 = vmatmul.mubr.msk.bf16.gmra.mrb[8].mxu1 %vm453_vm2, %v5044_v54 }
  0x75   : > { %4239 = vmatprep.mubr.msk.bf16.mxu1 %vm453_vm2, %v5055_v0 }
  0x77   : > { %4404 = vmatmul.mubr.msk.bf16.gmra.mrb[24].mxu0 %vm453_vm2, %v2136_v21  ;;  %v3844_v21 = vcombine.low %v905_v16, %v4982_v8  ;;  %v5408_v8 = vld [vmem:[%s4975_s25 + $0x58] sm:$0xff]   ;;  %v920_v16 = vrot.slane %v5044_v54, 1 }
  0x78   : > { %4407 = vmatprep.mubr.msk.bf16.mxu0 %vm453_vm2, %v2138_v24  ;;  %v2559_v24 = vrot.slane %v5389_v1, 2  ;;  %v2563_v43 = vrot.slane %v5408_v8, 2 }
  0x79   : > { %v911_v30 = vrot.slane %v3844_v21, 1  ;;  %v5450_v21 = vld [vmem:[%s4975_s25 + $0x78] sm:$0xff]   ;;  %v921_v54 = vsel %vm910_vm5, %v918_v61, %v920_v16 }
  0x7a   : > { %v2564_v44 = vsel %vm2107_vm4, %v2561_v42, %v2563_v43 }
  0x7c   : > { %4240 = vmatmul.mubr.msk.bf16.gmra.mrb[12].mxu1 %vm453_vm2, %v5083_v35 }
  0x7d   : > { %4243 = vmatprep.mubr.msk.bf16.mxu1 %vm453_vm2, %v5099_v51 }
  0x7f   : > { %4408 = vmatmul.mubr.msk.bf16.gmra.mrb[28].mxu0 %vm453_vm2, %v2140_v6  ;;  %v912_v6 = vrot.slane %v4988_v10, 1  ;;  %v914_v10 = vrot.slane %v5003_v19, 1 }
  0x80   : > { %4411 = vmatprep.mubr.msk.bf16.mxu0 %vm453_vm2, %v2142_v36  ;;  %v2560_v36 = vsel %vm2107_vm4, %v2557_v17, %v2559_v24 }
  0x81   : > { %v913_v18 = vsel %vm910_vm5, %v911_v30, %v912_v6  ;;  %v922_v30 = vrot.slane %v5055_v0, 1 }
  0x84   : > { %4244 = vmatmul.mubr.msk.bf16.gmra.mrb[16].mxu1 %vm453_vm2, %v5110_v63 }
  0x85   : > { %4247 = vmatprep.mubr.msk.bf16.mxu1 %vm453_vm2, %v5127_v25 }
  0x87   : > { %4412 = vmatmul.mubr.msk.bf16.gmra.mrb[32].mxu0 %vm453_vm2, %v2144_v45  ;;  %v2562_v45 = vsel %vm2107_vm4, %v2559_v24, %v2561_v42  ;;  %v924_v42 = vrot.slane %v5083_v35, 1  ;;  %v926_v35 = vrot.slane %v5099_v51, 1 }
  0x88   : > { %4417 = vmatprep.mubr.msk.bf16.mxu0 %vm453_vm2, %v2548_v47  ;;  %v5421_v47 = vld [vmem:[%s4975_s25 + $0x60] sm:$0xff]  }
  0x89   : > { %v2565_v19 = vrot.slane %v5421_v47, 2 }
  0x8c   : > { %4248 = vmatmul.mubr.msk.bf16.gmra.mrb[20].mxu1 %vm453_vm2, %v5137_v41 }
  0x8d   : > { %4251 = vmatprep.mubr.msk.bf16.mxu1 %vm453_vm2, %v5151_v58 }
  0x8f   : > { %4418 = vmatmul.mubr.msk.bf16.vlgmr.msra.gmra.mrb[0].mxu0 %vm453_vm2, %v2550_v52  ;;  %v5426_v52 = vld [vmem:[%s4975_s25 + $0x68] sm:$0xff]  }
  0x90   : > { %4454 = vmatpush3.bf16.msra.mxu0 %v3084_v62  ;;  %4421 = vmatprep.mubr.msk.bf16.mxu0 %vm453_vm2, %v2552_v14  ;;  %v915_v62 = vsel %vm910_vm5, %v912_v6, %v914_v10  ;;  %v917_v14 = vsel %vm910_vm5, %v914_v10, %v916_v23  ;;  %v2567_v33 = vrot.slane %v5426_v52, 2  ;;  %v923_v10 = vsel %vm910_vm5, %v920_v16, %v922_v30 }
  0x91   : > { %4828 = vmatprep.subr.msk.bf16.mxu0 %vm508_vm0, %v5371_v29  ;;  %v2860_v16 = vshrl.u32 %v5328_v37, 16 }
  0x92   : > { %v2568_v17 = vsel %vm2107_vm4, %v2565_v19, %v2567_v33 }
  0x94   : > { %4252 = vmatmul.mubr.msk.bf16.gmra.mrb[24].mxu1 %vm453_vm2, %v5156_v11 }
  0x95   : > { %4255 = vmatprep.mubr.msk.bf16.mxu1 %vm453_vm2, %v5173_v32 }
  0x97   : > { %4422 = vmatmul.mubr.msk.bf16.gmra.mrb[4].mxu0 %vm453_vm2, %v2554_v34  ;;  %v2566_v34 = vsel %vm2107_vm4, %v2563_v43, %v2565_v19  ;;  %v5468_v43 = vld [vmem:[%s4975_s25 + $0x88] sm:$0xff]   ;;  %v928_v19 = vrot.slane %v5110_v63, 1  ;;  %v2863_v63 = vshll.u32 %v5328_v37, 16 }
  0x98   : > { %4425 = vmatprep.mubr.msk.bf16.mxu0 %vm453_vm2, %v2556_v5  ;;  %v5441_v5 = vld [vmem:[%s4975_s25 + $0x70] sm:$0xff]   ;;  %v2575_v23 = vrot.slane %v5468_v43, 2 }
  0x99   : > { %v2569_v24 = vrot.slane %v5441_v5, 2  ;;  %v929_v51 = vsel %vm910_vm5, %v926_v35, %v928_v19 }
  0x9b   : > { %v2570_v6 = vsel %vm2107_vm4, %v2567_v33, %v2569_v24  ;;  %v927_v33 = vsel %vm910_vm5, %v924_v42, %v926_v35 }
  0x9c   : > { %4256 = vmatmul.mubr.msk.bf16.gmra.mrb[28].mxu1 %vm453_vm2, %v5179_v40 }
  0x9d   : > { %4259 = vmatprep.mubr.msk.bf16.mxu1 %vm453_vm2, %v5194_v56 }
  0x9f   : > { %4426 = vmatmul.mubr.msk.bf16.gmra.mrb[8].mxu0 %vm453_vm2, %v2558_v49  ;;  %v2571_v49 = vrot.slane %v5450_v21, 2 }
  0xa0   : > { %4429 = vmatprep.mubr.msk.bf16.mxu0 %vm453_vm2, %v2560_v36  ;;  %v5463_v36 = vld [vmem:[%s4975_s25 + $0x80] sm:$0xff]  }
  0xa1   : > { %v2573_v0 = vrot.slane %v5463_v36, 2 }
  0xa4   : > { %4260 = vmatmul.mubr.msk.bf16.gmra.mrb[32].mxu1 %vm453_vm2, %v5201_v4 }
  0xa5   : > { %4265 = vmatprep.mubr.msk.bf16.mxu1 %vm453_vm2, %v913_v18  ;;  %v2572_v18 = vsel %vm2107_vm4, %v2569_v24, %v2571_v49 }
  0xa7   : > { %4430 = vmatmul.mubr.msk.bf16.gmra.mrb[12].mxu0 %vm453_vm2, %v2562_v45  ;;  %v925_v45 = vsel %vm910_vm5, %v922_v30, %v924_v42  ;;  %v932_v30 = vrot.slane %v5137_v41, 1  ;;  %v2865_v42 = vrot.slane %v2863_v63, 3  ;;  %v2886_v41 = vshrl.u32 %v5348_v50, 16 }
  0xa8   : > { %4433 = vmatprep.mubr.msk.bf16.mxu0 %vm453_vm2, %v2564_v44  ;;  %v2574_v44 = vsel %vm2107_vm4, %v2571_v49, %v2573_v0  ;;  %v4897_v49 = vld [vmem:[%s4975_s25 + $0xa0] ss:$0 sps:$4 sm:$0x33]  }
  0xac   : > { %4266 = vmatmul.mubr.msk.bf16.vlgmr.msra.gmra.mrb[0].mxu1 %vm453_vm2, %v915_v62  ;;  %v5481_v62 = vld [vmem:[%s4975_s25 + $0x90] sm:$0xff]  }
  0xad   : > { %4269 = vmatprep.mubr.msk.bf16.mxu1 %vm453_vm2, %v917_v14  ;;  %4302 = vmatpush3.bf16.msra.mxu1 %v1441_v39  ;;  %v5485_v14 = vld [vmem:[%s4975_s25 + $0x98] sm:$0xff]   ;;  %v2576_v39 = vsel %vm2107_vm4, %v2573_v0, %v2575_v23  ;;  %v2577_v61 = vrot.slane %v5481_v62, 2  ;;  %v2581_v0 = vrot.slane %v4897_v49, 2 }
  0xae   : > { %4824 = vmatprep.subr.msk.bf16.mxu1 %vm508_vm0, %v4901_v9  ;;  %v2868_v9 = vshrl.u32 %v5331_v38, 16 }
  0xaf   : > { %4434 = vmatmul.mubr.msk.bf16.gmra.mrb[16].mxu0 %vm453_vm2, %v2566_v34  ;;  %v2579_v34 = vrot.slane %v5485_v14, 2  ;;  %v2578_v24 = vsel %vm2107_vm4, %v2575_v23, %v2577_v61  ;;  %v2880_v23 = vshll.u32 %v5344_v46, 16 }
  0xb0   : > { %4437 = vmatprep.mubr.msk.bf16.mxu0 %vm453_vm2, %v2568_v17  ;;  %v2871_v17 = vshll.u32 %v5331_v38, 16  ;;  %v2870_v37 = vrot.slane %v2868_v9, 2  ;;  %v2888_v9 = vrot.slane %v2886_v41, 2  ;;  %v2913_v41 = vshrl.u32 %v5385_v3, 16 }
  0xb4   : > { %4270 = vmatmul.mubr.msk.bf16.gmra.mrb[4].mxu1 %vm453_vm2, %v919_v48  ;;  %v930_v48 = vrot.slane %v5127_v25, 1 }
  0xb5   : > { %4273 = vmatprep.mubr.msk.bf16.mxu1 %vm453_vm2, %v921_v54  ;;  %v2580_v54 = vsel %vm2107_vm4, %v2577_v61, %v2579_v34 }
  0xb6   : > { %v933_v25 = vsel %vm910_vm5, %v930_v48, %v932_v30 }
  0xb7   : > { %4438 = vmatmul.mubr.msk.bf16.gmra.mrb[20].mxu0 %vm453_vm2, %v2570_v6  ;;  %v2862_v6 = vrot.slane %v2860_v16, 2  ;;  %v936_v16 = vrot.slane %v5156_v11, 1  ;;  %v2904_v11 = vshrl.u32 %v5366_v28, 16 }
  0xb8   : > { %4441 = vmatprep.mubr.msk.bf16.mxu0 %vm453_vm2, %v2572_v18  ;;  %v2873_v18 = vrot.slane %v2871_v17, 3 }
  0xb9   : > { %v2866_v35 = vor.u32 %v2865_v42, %v2862_v6  ;;  %v2907_v6 = vshll.u32 %v5366_v28, 16 }
  0xbc   : > { %4274 = vmatmul.mubr.msk.bf16.gmra.mrb[8].mxu1 %vm453_vm2, %v923_v10  ;;  %v931_v10 = vsel %vm910_vm5, %v928_v19, %v930_v48  ;;  %v934_v19 = vrot.slane %v5151_v58, 1  ;;  %v2895_v58 = vshrl.u32 %v5360_v53, 16 }
  0xbd   : > { %4277 = vmatprep.mubr.msk.bf16.mxu1 %vm453_vm2, %v925_v45  ;;  %v2877_v45 = vshrl.u32 %v5344_v46, 16 }
  0xbe   : > { %v935_v48 = vsel %vm910_vm5, %v932_v30, %v934_v19  ;;  %v938_v30 = vrot.slane %v5173_v32, 1  ;;  %v2916_v32 = vshll.u32 %v5385_v3, 16 }
  0xbf   : > { %4442 = vmatmul.mubr.msk.bf16.gmra.mrb[24].mxu0 %vm453_vm2, %v2574_v44  ;;  %v2874_v44 = vor.u32 %v2873_v18, %v2870_v37  ;;  %v2879_v61 = vrot.slane %v2877_v45, 2  ;;  %v2897_v37 = vrot.slane %v2895_v58, 2  ;;  %v2906_v45 = vrot.slane %v2904_v11, 2 }
  0xc0   : > { %4445 = vmatprep.mubr.msk.bf16.mxu0 %vm453_vm2, %v2576_v39  ;;  %v2889_v39 = vshll.u32 %v5348_v50, 16  ;;  %v2931_v58 = vshrl.u32 %v5403_v13, 16  ;;  %v2943_v11 = vshll.u32 %v5408_v8, 16 }
  0xc1   : > { %v2875_v63 = vsel %vm2858_vm6, %v2866_v35, %v2874_v44  ;;  %v939_v35 = vsel %vm910_vm5, %v936_v16, %v938_v30 }
  0xc2   : > { %v2891_v17 = vrot.slane %v2889_v39, 3 }
  0xc4   : > { %4278 = vmatmul.mubr.msk.bf16.gmra.mrb[12].mxu1 %vm453_vm2, %v927_v33  ;;  %v2582_v33 = vsel %vm2107_vm4, %v2579_v34, %v2581_v0  ;;  %v2898_v34 = vshll.u32 %v5360_v53, 16  ;;  %v2892_v49 = vor.u32 %v2891_v17, %v2888_v9  ;;  %v3397_v0 = vsel %vm508_vm0, %v5371_v29, 0 }
  0xc5   : > { %4281 = vmatprep.mubr.msk.bf16.mxu1 %vm453_vm2, %v929_v51  ;;  %v2882_v51 = vrot.slane %v2880_v23, 3  ;;  %v2909_v23 = vrot.slane %v2907_v6, 3  ;;  %v2922_v29 = vshrl.u32 %v5389_v1, 16 }
  0xc6   : > { %v2900_v18 = vrot.slane %v2898_v34, 3  ;;  %v2934_v34 = vshll.u32 %v5403_v13, 16 }
  0xc7   : > { %4446 = vmatmul.mubr.msk.bf16.gmra.mrb[28].mxu0 %vm453_vm2, %v2578_v24  ;;  %v2883_v24 = vor.u32 %v2882_v51, %v2879_v61  ;;  %v2910_v39 = vor.u32 %v2909_v23, %v2906_v45  ;;  %v2915_v61 = vrot.slane %v2913_v41, 2  ;;  %v2918_v51 = vrot.slane %v2916_v32, 3 }
  0xc8   : > { %4449 = vmatprep.mubr.msk.bf16.mxu0 %vm453_vm2, %v2580_v54  ;;  %v937_v54 = vsel %vm910_vm5, %v934_v19, %v936_v16  ;;  %v2925_v19 = vshll.u32 %v5389_v1, 16  ;;  %v2924_v17 = vrot.slane %v2922_v29, 2  ;;  %v2945_v23 = vrot.slane %v2943_v11, 3  ;;  %v4903_v29 = vld [vmem:[%s4975_s25 + $0x18] sm:$0xff]  }
  0xc9   : > { %v2884_v42 = vsel %vm2858_vm6, %v2874_v44, %v2883_v24  ;;  %v2901_v44 = vor.u32 %v2900_v18, %v2897_v37  ;;  %v2936_v37 = vrot.slane %v2934_v34, 3  ;;  %v1349_v18 = vrot.slane %v5006_v20, 1 }
  0xca   : > { %v2949_v32 = vshrl.u32 %v5421_v47, 16  ;;  %v2952_v20 = vshll.u32 %v5421_v47, 16  ;;  %v2970_v34 = vshll.u32 %v5441_v5, 16  ;;  %v2979_v11 = vshll.u32 %v5450_v21, 16 }
  0xcb   : > { %v2902_v16 = vsel %vm2858_vm6, %v2892_v49, %v2901_v44  ;;  %v2911_v9 = vsel %vm2858_vm6, %v2901_v44, %v2910_v39 }
  0xcc   : > { %4282 = vmatmul.mubr.msk.bf16.gmra.mrb[16].mxu1 %vm453_vm2, %v931_v10  ;;  %v940_v10 = vrot.slane %v5179_v40, 1 }
  0xcd   : > { %4285 = vmatprep.mubr.msk.bf16.mxu1 %vm453_vm2, %v933_v25  ;;  %v2893_v25 = vsel %vm2858_vm6, %v2883_v24, %v2892_v49 }
  0xce   : > { %v941_v40 = vsel %vm910_vm5, %v938_v30, %v940_v10  ;;  %v946_v30 = vrot.slane %v5224_v27, 1 }
  0xcf   : > { %4450 = vmatmul.mubr.msk.bf16.gmra.mrb[32].mxu0 %vm453_vm2, %v2582_v33  ;;  %v942_v33 = vrot.slane %v5194_v56, 1 }
  0xd0   : > { %4455 = vmatprep.mubr.msk.bf16.mxu0 %vm453_vm2, %v2875_v63  ;;  %v944_v63 = vrot.slane %v5201_v4, 1  ;;  %v2940_v4 = vshrl.u32 %v5408_v8, 16 }
  0xd1   : > { %v943_v24 = vsel %vm910_vm5, %v940_v10, %v942_v33  ;;  %v4902_v10 = vld [vmem:[%s4975_s25 + $0x10] sm:$0xff]  }
  0xd2   : > { %v945_v56 = vsel %vm910_vm5, %v942_v33, %v944_v63  ;;  %v2942_v45 = vrot.slane %v2940_v4, 2  ;;  %v2976_v4 = vshrl.u32 %v5450_v21, 16 }
  0xd4   : > { %4286 = vmatmul.mubr.msk.bf16.gmra.mrb[20].mxu1 %vm453_vm2, %v935_v48  ;;  %v2927_v48 = vrot.slane %v2925_v19, 3  ;;  %v2946_v44 = vor.u32 %v2945_v23, %v2942_v45  ;;  %v1352_v19 = vrot.slane %v4903_v29, 1  ;;  %v2978_v45 = vrot.slane %v2976_v4, 2 }
  0xd5   : > { %4289 = vmatprep.mubr.msk.bf16.mxu1 %vm453_vm2, %v937_v54  ;;  %v2919_v54 = vor.u32 %v2918_v51, %v2915_v61  ;;  %v2951_v61 = vrot.slane %v2949_v32, 2  ;;  %v2954_v51 = vrot.slane %v2952_v20, 3  ;;  %v2981_v23 = vrot.slane %v2979_v11, 3  ;;  %v4909_v11 = vld [vmem:[%s4975_s25 + $0x48] sm:$0xff]  }
  0xd6   : > { %v2928_v49 = vor.u32 %v2927_v48, %v2924_v17  ;;  %v2988_v32 = vshll.u32 %v5463_v36, 16  ;;  %v3015_v4 = vshll.u32 %v5485_v14, 16 }
  0xd7   : > { %4456 = vmatmul.mubr.msk.bf16.vlgmr.msra.gmra.mrb[0].mxu0 %vm453_vm2, %v2884_v42  ;;  %v2920_v6 = vsel %vm2858_vm6, %v2910_v39, %v2919_v54  ;;  %v2933_v42 = vrot.slane %v2931_v58, 2  ;;  %v2961_v39 = vshll.u32 %v5426_v52, 16  ;;  %v2967_v58 = vshrl.u32 %v5441_v5, 16 }
  0xd8   : > { %4492 = vmatpush3.bf16.msra.mxu0 %v3397_v0  ;;  %4459 = vmatprep.mubr.msk.bf16.mxu0 %vm453_vm2, %v2893_v25  ;;  %v1350_v0 = vrot.slane %v4902_v10, 1  ;;  %v2929_v25 = vsel %vm2858_vm6, %v2919_v54, %v2928_v49  ;;  %v2955_v54 = vor.u32 %v2954_v51, %v2951_v61  ;;  %v4906_v10 = vld [vmem:[%s4975_s25 + $0x30] sm:$0xff]   ;;  %v2982_v20 = vor.u32 %v2981_v23, %v2978_v45  ;;  %v4908_v51 = vld [vmem:[%s4975_s25 + $0x40] sm:$0xff]  }
  0xd9   : > { %v2937_v41 = vor.u32 %v2936_v37, %v2933_v42  ;;  %v2963_v48 = vrot.slane %v2961_v39, 3  ;;  %v2969_v37 = vrot.slane %v2967_v58, 2  ;;  %v4907_v39 = vld [vmem:[%s4975_s25 + $0x38] sm:$0xff]   ;;  %v2990_v61 = vrot.slane %v2988_v32, 3 }
  0xda   : > { %v1351_v27 = vsel %vm910_vm5, %v1349_v18, %v1350_v0  ;;  %v2956_v42 = vsel %vm2858_vm6, %v2946_v44, %v2955_v54  ;;  %v2972_v18 = vrot.slane %v2970_v34, 3  ;;  %v1360_v29 = vrot.slane %v4907_v39, 1 }
  0xdb   : > { %v2938_v33 = vsel %vm2858_vm6, %v2928_v49, %v2937_v41  ;;  %v3006_v58 = vshll.u32 %v5481_v62, 16  ;;  %v3017_v23 = vrot.slane %v3015_v4, 3  ;;  %v3310_v4 = vrot.slane %v5348_v50, 3 }
  0xdc   : > { %4290 = vmatmul.mubr.msk.bf16.gmra.mrb[24].mxu1 %vm453_vm2, %v939_v35  ;;  %v947_v35 = vsel %vm910_vm5, %v944_v63, %v946_v30  ;;  %v3312_v50 = vrot.slane %v5360_v53, 3 }
  0xdd   : > { %4293 = vmatprep.mubr.msk.bf16.mxu1 %vm453_vm2, %v941_v40  ;;  %v2958_v40 = vshrl.u32 %v5426_v52, 16 }
  0xdf   : > { %4460 = vmatmul.mubr.msk.bf16.gmra.mrb[4].mxu0 %vm453_vm2, %v2902_v16  ;;  %v4904_v16 = vld [vmem:[%s4975_s25 + $0x20] sm:$0xff]   ;;  %v2960_v17 = vrot.slane %v2958_v40, 2  ;;  %v2997_v40 = vshll.u32 %v5468_v43, 16 }
  0xe0   : > { %4463 = vmatprep.mubr.msk.bf16.mxu0 %vm453_vm2, %v2911_v9  ;;  %v1354_v63 = vrot.slane %v4904_v16, 1  ;;  %v2947_v9 = vsel %vm2858_vm6, %v2937_v41, %v2946_v44  ;;  %v2973_v41 = vor.u32 %v2972_v18, %v2969_v37  ;;  %v2994_v44 = vshrl.u32 %v5468_v43, 16  ;;  %v4910_v18 = vld [vmem:[%s4975_s25 + $0x50] sm:$0xff]  }
  0xe1   : > { %v2964_v49 = vor.u32 %v2963_v48, %v2960_v17  ;;  %v1362_v16 = vrot.slane %v4908_v51, 1  ;;  %v2999_v17 = vrot.slane %v2997_v40, 3  ;;  %v3008_v37 = vrot.slane %v3006_v58, 3  ;;  %v4911_v40 = vld [vmem:[%s4975_s25 + $0x58] sm:$0xff]  }
  0xe2   : > { %v1368_v39 = vrot.slane %v4911_v40, 1  ;;  %v1770_v40 = vshrl.u32 %v5270_v57, 16 }
  0xe4   : > { %4294 = vmatmul.mubr.msk.bf16.gmra.mrb[28].mxu1 %vm453_vm2, %v943_v24  ;;  %v1353_v24 = vsel %vm910_vm5, %v1350_v0, %v1352_v19  ;;  %v1358_v0 = vrot.slane %v4906_v10, 1  ;;  %v1366_v10 = vrot.slane %v4910_v18, 1  ;;  %v3314_v18 = vrot.slane %v5366_v28, 3 }
  0xe5   : > { %4297 = vmatprep.mubr.msk.bf16.mxu1 %vm453_vm2, %v945_v56  ;;  %v1355_v56 = vsel %vm910_vm5, %v1352_v19, %v1354_v63  ;;  %v2974_v19 = vsel %vm2858_vm6, %v2964_v49, %v2973_v41 }
  0xe6   : > { %v1361_v48 = vsel %vm910_vm5, %v1358_v0, %v1360_v29  ;;  %v3315_v53 = vsel %vm3304_vm7, %v3312_v50, %v3314_v18 }
  0xe7   : > { %4464 = vmatmul.mubr.msk.bf16.gmra.mrb[8].mxu0 %vm453_vm2, %v2920_v6  ;;  %v4905_v6 = vld [vmem:[%s4975_s25 + $0x28] sm:$0xff]  }
  0xe8   : > { %4467 = vmatprep.mubr.msk.bf16.mxu0 %vm453_vm2, %v2929_v25  ;;  %v1356_v30 = vrot.slane %v4905_v6, 1  ;;  %v2965_v25 = vsel %vm2858_vm6, %v2955_v54, %v2964_v49  ;;  %v1363_v54 = vsel %vm910_vm5, %v1360_v29, %v1362_v16  ;;  %v3012_v49 = vshrl.u32 %v5485_v14, 16 }
  0xe9   : > { %v1364_v6 = vrot.slane %v4909_v11, 1  ;;  %v1376_v11 = vrot.slane %v5288_v7, 1 }
  0xea   : > { %v3014_v45 = vrot.slane %v3012_v49, 2 }
  0xec   : > { %4298 = vmatmul.mubr.msk.bf16.gmra.mrb[32].mxu1 %vm453_vm2, %v947_v35  ;;  %v1357_v35 = vsel %vm910_vm5, %v1354_v63, %v1356_v30  ;;  %v2983_v63 = vsel %vm2858_vm6, %v2973_v41, %v2982_v20 }
  0xed   : > { %4303 = vmatprep.mubr.msk.bf16.mxu1 %vm453_vm2, %v1351_v27  ;;  %v2985_v27 = vshrl.u32 %v5463_v36, 16 }
  0xef   : > { %4468 = vmatmul.mubr.msk.bf16.gmra.mrb[12].mxu0 %vm453_vm2, %v2938_v33  ;;  %v2987_v33 = vrot.slane %v2985_v27, 2 }
  0xf0   : > { %4471 = vmatprep.mubr.msk.bf16.mxu0 %vm453_vm2, %v2947_v9  ;;  %v2996_v9 = vrot.slane %v2994_v44, 2  ;;  %v3299_v44 = vld [vmem:[%s4975_s25 + $0x10] sm:$0x8] }
  0xf2   : > { %v3000_v34 = vor.u32 %v2999_v17, %v2996_v9 }
  0xf4   : > { %4304 = vmatmul.mubr.msk.bf16.vlgmr.msra.gmra.mrb[0].mxu1 %vm453_vm2, %v1353_v24  ;;  %v2991_v24 = vor.u32 %v2990_v61, %v2987_v33  ;;  %v1370_v61 = vrot.slane %v5251_v55, 1 }
  0xf5   : > { %4307 = vmatprep.mubr.msk.bf16.mxu1 %vm453_vm2, %v1355_v56  ;;  %4530 = vmatpush3.bf16.msra.mxu1 %v4957_v2  ;;  %v1359_v2 = vsel %vm910_vm5, %v1356_v30, %v1358_v0  ;;  %v3003_v56 = vshrl.u32 %v5481_v62, 16  ;;  %v5621_v0 = vld [vmem:[%s4975_s25 + $0xa0] ss:$0 sps:$4 sm:$0x77]  }
  0xf6   : > { %v2992_v30 = vsel %vm2858_vm6, %v2982_v20, %v2991_v24  ;;  %v3021_v27 = vshrl.u32 %v5621_v0, 16  ;;  %v3024_v32 = vshll.u32 %v5621_v0, 16  ;;  %v3018_v20 = vor.u32 %v3017_v23, %v3014_v45 }
  0xf7   : > { %4472 = vmatmul.mubr.msk.bf16.gmra.mrb[16].mxu0 %vm453_vm2, %v2956_v42  ;;  %v3005_v42 = vrot.slane %v3003_v56, 2  ;;  %v1371_v17 = vsel %vm910_vm5, %v1368_v39, %v1370_v61  ;;  %v1374_v56 = vrot.slane %v5276_v60, 1  ;;  %v1382_v45 = vrot.slane %v5308_v26, 1 }
  0xf8   : > { %4475 = vmatprep.mubr.msk.bf16.mxu0 %vm453_vm2, %v2965_v25  ;;  %v3001_v25 = vsel %vm2858_vm6, %v2991_v24, %v3000_v34  ;;  %v3026_v33 = vrot.slane %v3024_v32, 3  ;;  %v3306_v24 = vrot.slane %v5331_v38, 3  ;;  %v3308_v38 = vrot.slane %v5344_v46, 3 }
  0xf9   : > { %v3009_v41 = vor.u32 %v3008_v37, %v3005_v42  ;;  %v1377_v46 = vsel %vm910_vm5, %v1374_v56, %v1376_v11  ;;  %v1761_v23 = vshrl.u32 %v5251_v55, 16 }
  0xfa   : > { %v3311_v42 = vsel %vm3304_vm7, %v3308_v38, %v3310_v4 }
  0xfb   : > { %v3010_v29 = vsel %vm2858_vm6, %v3000_v34, %v3009_v41  ;;  %v3019_v51 = vsel %vm2858_vm6, %v3009_v41, %v3018_v20  ;;  %v4900_v41 = vld [vmem:[%s4975_s25 + $0x98] ss:$0 sps:$4 sm:$0x11]   ;;  %v1763_v32 = vrot.slane %v1761_v23, 1 }
  0xfc   : > { %4308 = vmatmul.mubr.msk.bf16.gmra.mrb[4].mxu1 %vm453_vm2, %v1357_v35  ;;  %v1365_v35 = vsel %vm910_vm5, %v1362_v16, %v1364_v6  ;;  %v3994_v16 = vcombine.low %v3299_v44, %v5318_v31  ;;  %v3318_v44 = vrot.slane %v5389_v1, 3 }
  0xfd   : > { %4311 = vmatprep.mubr.msk.bf16.mxu1 %vm453_vm2, %v1359_v2  ;;  %v1367_v2 = vsel %vm910_vm5, %v1364_v6, %v1366_v10  ;;  %v3309_v6 = vsel %vm3304_vm7, %v3306_v24, %v3308_v38 }
  0xff   : > { %4476 = vmatmul.mubr.msk.bf16.gmra.mrb[20].mxu0 %vm453_vm2, %v2974_v19  ;;  %v3023_v19 = vrot.slane %v3021_v27, 2 }
 0x100   : > { %4479 = vmatprep.mubr.msk.bf16.mxu0 %vm453_vm2, %v2983_v63  ;;  %v1369_v63 = vsel %vm910_vm5, %v1366_v10, %v1368_v39  ;;  %v1380_v10 = vrot.slane %v5304_v22, 1  ;;  %v1773_v39 = vshll.u32 %v5270_v57, 16 }
 0x101   : > { %v3027_v9 = vor.u32 %v3026_v33, %v3023_v19  ;;  %v1782_v33 = vshll.u32 %v5276_v60, 16 }
 0x102   : > { %v1383_v27 = vsel %vm910_vm5, %v1380_v10, %v1382_v45 }
 0x103   : > { %v3028_v31 = vsel %vm2858_vm6, %v3018_v20, %v3027_v9 }
 0x104   : > { %4312 = vmatmul.mubr.msk.bf16.gmra.mrb[8].mxu1 %vm453_vm2, %v1361_v48  ;;  %v3305_v48 = vrot.slane %v3994_v16, 3  ;;  %v1775_v16 = vrot.slane %v1773_v39, 2 }
 0x105   : > { %4315 = vmatprep.mubr.msk.bf16.mxu1 %vm453_vm2, %v1363_v54  ;;  %v1372_v54 = vrot.slane %v5270_v57, 1 }
 0x106   : > { %v3307_v58 = vsel %vm3304_vm7, %v3305_v48, %v3306_v24  ;;  %v3322_v48 = vrot.slane %v5408_v8, 3  ;;  %v1788_v24 = vshrl.u32 %v5288_v7, 16 }
 0x107   : > { %4480 = vmatmul.mubr.msk.bf16.gmra.mrb[24].mxu0 %vm453_vm2, %v2992_v30  ;;  %v1373_v34 = vsel %vm910_vm5, %v1370_v61, %v1372_v54  ;;  %v1375_v49 = vsel %vm910_vm5, %v1372_v54, %v1374_v56  ;;  %v1378_v30 = vrot.slane %v5292_v12, 1  ;;  %v1791_v54 = vshll.u32 %v5288_v7, 16 }
 0x108   : > { %4483 = vmatprep.mubr.msk.bf16.mxu0 %vm453_vm2, %v3001_v25  ;;  %v3313_v25 = vsel %vm3304_vm7, %v3310_v4, %v3312_v50 }
 0x109   : > { %v1379_v37 = vsel %vm910_vm5, %v1376_v11, %v1378_v30  ;;  %v1381_v28 = vsel %vm910_vm5, %v1378_v30, %v1380_v10  ;;  %v1793_v38 = vrot.slane %v1791_v54, 2  ;;  %v1806_v30 = vshrl.u32 %v5304_v22, 16 }
 0x10b   : > { %v1808_v10 = vrot.slane %v1806_v30, 1 }
 0x10c   : > { %4316 = vmatmul.mubr.msk.bf16.gmra.mrb[12].mxu1 %vm453_vm2, %v1365_v35  ;;  %v1764_v35 = vshll.u32 %v5251_v55, 16  ;;  %v1384_v55 = vrot.slane %v4900_v41, 1  ;;  %v1827_v41 = vshll.u32 %v5324_v59, 16 }
 0x10d   : > { %4319 = vmatprep.mubr.msk.bf16.mxu1 %vm453_vm2, %v1367_v2  ;;  %v3316_v2 = vrot.slane %v5385_v3, 3  ;;  %v1779_v3 = vshrl.u32 %v5276_v60, 16 }
 0x10e   : > { %v1766_v20 = vrot.slane %v1764_v35, 2  ;;  %v1385_v1 = vsel %vm910_vm5, %v1382_v45, %v1384_v55  ;;  %v3328_v45 = vrot.slane %v5441_v5, 3 }
 0x10f   : > { %4484 = vmatmul.mubr.msk.bf16.gmra.mrb[28].mxu0 %vm453_vm2, %v3010_v29  ;;  %v3317_v29 = vsel %vm3304_vm7, %v3314_v18, %v3316_v2  ;;  %v3319_v61 = vsel %vm3304_vm7, %v3316_v2, %v3318_v44  ;;  %v1781_v9 = vrot.slane %v1779_v3, 1  ;;  %v3338_v3 = vrot.slane %v5485_v14, 3 }
 0x110   : > { %4487 = vmatprep.mubr.msk.bf16.mxu0 %vm453_vm2, %v3019_v51  ;;  %v1767_v19 = vor.u32 %v1766_v20, %v1763_v32  ;;  %v1772_v51 = vrot.slane %v1770_v40, 1  ;;  %v3334_v40 = vrot.slane %v5468_v43, 3 }
 0x112   : > { %v1768_v57 = vsel %vm1661_vm3, %v5165_v15, %v1767_v19  ;;  %v1776_v60 = vor.u32 %v1775_v16, %v1772_v51  ;;  %v1800_v15 = vshll.u32 %v5292_v12, 16 }
 0x114   : > { %4320 = vmatmul.mubr.msk.bf16.gmra.mrb[16].mxu1 %vm453_vm2, %v1369_v63  ;;  %v3320_v63 = vrot.slane %v5403_v13, 3  ;;  %v1797_v13 = vshrl.u32 %v5292_v12, 16  ;;  %v1777_v8 = vsel %vm1661_vm3, %v1767_v19, %v1776_v60  ;;  %v1802_v11 = vrot.slane %v1800_v15, 2 }
 0x115   : > { %4323 = vmatprep.mubr.msk.bf16.mxu1 %vm453_vm2, %v1371_v17  ;;  %v1784_v17 = vrot.slane %v1782_v33, 2 }
 0x116   : > { %v1799_v4 = vrot.slane %v1797_v13, 1 }
 0x117   : > { %4488 = vmatmul.mubr.msk.bf16.gmra.mrb[32].mxu0 %vm453_vm2, %v3028_v31  ;;  %v3321_v31 = vsel %vm3304_vm7, %v3318_v44, %v3320_v63  ;;  %v1785_v56 = vor.u32 %v1784_v17, %v1781_v9  ;;  %v3332_v44 = vrot.slane %v5463_v36, 3  ;;  %v3336_v36 = vrot.slane %v5481_v62, 3 }
 0x118   : > { %4493 = vmatprep.mubr.msk.bf16.mxu0 %vm453_vm2, %v3307_v58  ;;  %v3323_v58 = vsel %vm3304_vm7, %v3320_v63, %v3322_v48  ;;  %v1803_v50 = vor.u32 %v1802_v11, %v1799_v4 }
 0x119   : > { %v1786_v7 = vsel %vm1661_vm3, %v1776_v60, %v1785_v56  ;;  %v3337_v43 = vsel %vm3304_vm7, %v3334_v40, %v3336_v36  ;;  %v3339_v33 = vsel %vm3304_vm7, %v3336_v36, %v3338_v3 }
 0x11c   : > { %4324 = vmatmul.mubr.msk.bf16.gmra.mrb[20].mxu1 %vm453_vm2, %v1373_v34  ;;  %v1790_v34 = vrot.slane %v1788_v24, 1 }
 0x11d   : > { %4327 = vmatprep.mubr.msk.bf16.mxu1 %vm453_vm2, %v1375_v49  ;;  %v3324_v49 = vrot.slane %v5421_v47, 3  ;;  %v1815_v47 = vshrl.u32 %v5308_v26, 16 }
 0x11e   : > { %v1794_v12 = vor.u32 %v1793_v38, %v1790_v34 }
 0x11f   : > { %4494 = vmatmul.mubr.msk.bf16.vlgmr.msra.gmra.mrb[0].mxu0 %vm453_vm2, %v3309_v6  ;;  %v3326_v6 = vrot.slane %v5426_v52, 3  ;;  %v1817_v23 = vrot.slane %v1815_v47, 1 }
 0x120   : > { %4497 = vmatprep.mubr.msk.bf16.mxu0 %vm453_vm2, %v3311_v42  ;;  %v1809_v42 = vshll.u32 %v5304_v22, 16  ;;  %v1795_v52 = vsel %vm1661_vm3, %v1785_v56, %v1794_v12  ;;  %v1804_v22 = vsel %vm1661_vm3, %v1794_v12, %v1803_v50 }
 0x121   : > { %v3327_v18 = vsel %vm3304_vm7, %v3324_v49, %v3326_v6  ;;  %v3329_v2 = vsel %vm3304_vm7, %v3326_v6, %v3328_v45 }
 0x124   : > { %4328 = vmatmul.mubr.msk.bf16.gmra.mrb[24].mxu1 %vm453_vm2, %v1377_v46  ;;  %v3325_v46 = vsel %vm3304_vm7, %v3322_v48, %v3324_v49  ;;  %v5774_v49 = vld [vmem:[%s5866_s2] ss:$0 sm:$0xff] }
 0x125   : > { %4331 = vmatprep.mubr.msk.bf16.mxu1 %vm453_vm2, %v1379_v37  ;;  %v1818_v37 = vshll.u32 %v5308_v26, 16 }
 0x127   : > { %4498 = vmatmul.mubr.msk.bf16.gmra.mrb[4].mxu0 %vm453_vm2, %v3313_v25  ;;  %v1811_v25 = vrot.slane %v1809_v42, 2  ;;  %v1820_v35 = vrot.slane %v1818_v37, 2 }
 0x128   : > { %4501 = vmatprep.mubr.msk.bf16.mxu0 %vm453_vm2, %v3315_v53  ;;  %v3330_v53 = vrot.slane %v5450_v21, 3  ;;  %v1829_v21 = vrot.slane %v1827_v41, 2 }
 0x129   : > { %v1812_v26 = vor.u32 %v1811_v25, %v1808_v10 }
 0x12a   : > { %v3331_v5 = vsel %vm3304_vm7, %v3328_v45, %v3330_v53  ;;  %v3333_v39 = vsel %vm3304_vm7, %v3330_v53, %v3332_v44 }
 0x12b   : > { %v1813_v32 = vsel %vm1661_vm3, %v1803_v50, %v1812_v26 }
 0x12c   : > { %4332 = vmatmul.mubr.msk.bf16.gmra.mrb[28].mxu1 %vm453_vm2, %v1381_v28  ;;  %v1824_v28 = vshrl.u32 %v5324_v59, 16 }
 0x12d   : > { %4335 = vmatprep.mubr.msk.bf16.mxu1 %vm453_vm2, %v1383_v27  ;;  %v1821_v27 = vor.u32 %v1820_v35, %v1817_v23 }
 0x12e   : > { %v1826_v20 = vrot.slane %v1824_v28, 1 }
 0x12f   : > { %4502 = vmatmul.mubr.msk.bf16.gmra.mrb[8].mxu0 %vm453_vm2, %v3317_v29  ;;  %v1822_v55 = vsel %vm1661_vm3, %v1812_v26, %v1821_v27  ;;  %v3335_v29 = vsel %vm3304_vm7, %v3332_v44, %v3334_v40 }
 0x130   : > { %4505 = vmatprep.mubr.msk.bf16.mxu0 %vm453_vm2, %v3319_v61  ;;  %v1830_v59 = vor.u32 %v1829_v21, %v1826_v20  ;;  %v3340_v61 = vrot.slane %v5621_v0, 3 }
 0x132   : > { %v1831_v19 = vsel %vm1661_vm3, %v1821_v27, %v1830_v59 }
 0x134   : > { %4336 = vmatmul.mubr.msk.bf16.gmra.mrb[32].mxu1 %vm453_vm2, %v1385_v1  ;;  %v3341_v1 = vsel %vm3304_vm7, %v3338_v3, %v3340_v61 }
 0x135   : > { %4361 = vmatprep.mubr.msk.bf16.mxu1 %vm453_vm2, %v1768_v57 }
 0x137   : > { %4506 = vmatmul.mubr.msk.bf16.gmra.mrb[12].mxu0 %vm453_vm2, %v3321_v31 }
 0x138   : > { %4509 = vmatprep.mubr.msk.bf16.mxu0 %vm453_vm2, %v3323_v58 }
 0x13c   : > { %4362 = vmatmul.mubr.msk.bf16.vlgmr.msra.gmra.mrb[20].mxu1 %vm453_vm2, %v1777_v8 }
 0x13d   : > { %4365 = vmatprep.mubr.msk.bf16.mxu1 %vm453_vm2, %v1786_v7 }
 0x13f   : > { %4510 = vmatmul.mubr.msk.bf16.gmra.mrb[16].mxu0 %vm453_vm2, %v3325_v46 }
 0x140   : > { %4513 = vmatprep.mubr.msk.bf16.mxu0 %vm453_vm2, %v3327_v18 }
 0x144   : > { %4366 = vmatmul.mubr.msk.bf16.gmra.mrb[24].mxu1 %vm453_vm2, %v1795_v52 }
 0x145   : > { %4369 = vmatprep.mubr.msk.bf16.mxu1 %vm453_vm2, %v1804_v22 }
 0x147   : > { %4514 = vmatmul.mubr.msk.bf16.gmra.mrb[20].mxu0 %vm453_vm2, %v3329_v2 }
 0x148   : > { %4517 = vmatprep.mubr.msk.bf16.mxu0 %vm453_vm2, %v3331_v5 }
 0x14c   : > { %4370 = vmatmul.mubr.msk.bf16.gmra.mrb[28].mxu1 %vm453_vm2, %v1813_v32 }
 0x14d   : > { %4373 = vmatprep.mubr.msk.bf16.mxu1 %vm453_vm2, %v1822_v55 }
 0x14f   : > { %4518 = vmatmul.mubr.msk.bf16.gmra.mrb[24].mxu0 %vm453_vm2, %v3333_v39 }
 0x150   : > { %4521 = vmatprep.mubr.msk.bf16.mxu0 %vm453_vm2, %v3335_v29 }
 0x154   : > { %4374 = vmatmul.mubr.msk.bf16.gmra.mrb[32].mxu1 %vm453_vm2, %v1831_v19 }
 0x157   : > { %4522 = vmatmul.mubr.msk.bf16.gmra.mrb[28].mxu0 %vm453_vm2, %v3337_v43 }
 0x158   : > { %4525 = vmatprep.mubr.msk.bf16.mxu0 %vm453_vm2, %v3339_v33 }
 0x15f   : > { %4526 = vmatmul.mubr.msk.bf16.gmra.mrb[32].mxu0 %vm453_vm2, %v3341_v1 }
 0x1c7   : > { %v4305_v51 = vpop.f32.mrb[0].mxu1 }
 0x1c8   : > { %v1477_v62 = vpop.f32.mrb[1].mxu1 }
 0x1c9   : > { %v4306_v16 = vpop.f32.mrb[2].mxu1 }
 0x1ca   : > { %v1480_v14 = vpop.f32.mrb[3].mxu1 }
 0x1cf   : > { %v4309_v63 = vpop.f32.mrb[4].mxu1 }
 0x1d0   : > { %v1493_v57 = vpop.f32.mrb[5].mxu1 }
 0x1d1   : > { %v4310_v9 = vpop.f32.mrb[6].mxu1 }
 0x1d2   : > { %v1496_v17 = vpop.f32.mrb[7].mxu1 }
 0x1d7   : > { %v4313_v48 = vpop.f32.mrb[8].mxu1 }
 0x1d8   : > { %v1509_v60 = vpop.f32.mrb[9].mxu1 }
 0x1d9   : > { %v4314_v24 = vpop.f32.mrb[10].mxu1 }
 0x1da   : > { %v1512_v54 = vpop.f32.mrb[11].mxu1 }
 0x1df   : > { %v5754_v31 = vpop.f32.mrb[12].mxu1 }
 0x1e0   : > { %v5756_v0 = vpop.f32.mrb[13].mxu1 }
 0x1e1   : > { %v5758_v56 = vpop.f32.mrb[14].mxu1 }
 0x1e2   : > { %v5760_v13 = vpop.f32.mrb[15].mxu1 }
 0x1e7   : > { %v5762_v15 = vpop.f32.mrb[16].mxu1 }
 0x1e8   : > { %v5764_v58 = vpop.f32.mrb[17].mxu1 }
 0x1e9   : > { %v5766_v8 = vpop.f32.mrb[18].mxu1 }
 0x1ea   : > { %v5768_v34 = vpop.f32.mrb[19].mxu1 }
 0x1f2   : > { %v4495_v38 = vpop.f32.mrb[0].mxu0 }
 0x1f3   : > { %v4531_v7 = vadd.f32 %v4495_v38, %v4305_v51  ;;  %v3433_v4 = vpop.f32.mrb[1].mxu0 }
 0x1f4   : > { %v4532_v11 = vadd.f32 %v3433_v4, %v1477_v62  ;;  %v4496_v6 = vpop.f32.mrb[2].mxu0 }
 0x1f5   : > { %v3621_v12 = vadd.f32 %v4531_v7, %v5774_v49  ;;  %v4533_v30 = vadd.f32 %v4496_v6, %v4306_v16  ;;  %v3436_v42 = vpop.f32.mrb[3].mxu0 }
 0x1f6   : > { %v3619_v46 = vadd.f32 %v4532_v11, %v5774_v49  ;;  %v4534_v50 = vadd.f32 %v3436_v42, %v1480_v14 }
 0x1f7   : > { %v3657_v47 = vmax.f32 %v3621_v12, 0.0  ;;  %v3622_v37 = vadd.f32 %v4533_v30, %v5774_v49 }
 0x1f8   : > { %v3655_v18 = vmax.f32 %v3619_v46, 0.0  ;;  %v3620_v52 = vadd.f32 %v4534_v50, %v5774_v49 }
 0x1f9   : > { %3693 = vst [vmem:[%s5780_s18 + $0x10] sm:$0xff] %v3657_v47  ;;  %v3658_v10 = vmax.f32 %v3622_v37, 0.0 }
 0x1fa   : > { %3691 = vst [vmem:[%s5780_s18] sm:$0xff] %v3655_v18  ;;  %v3656_v25 = vmax.f32 %v3620_v52, 0.0  ;;  %v4499_v45 = vpop.f32.mrb[4].mxu0 }
 0x1fb   : > { %3694 = vst [vmem:[%s5780_s18 + $0x18] sm:$0xff] %v3658_v10  ;;  %v4535_v22 = vadd.f32 %v4499_v45, %v4309_v63  ;;  %v3449_v23 = vpop.f32.mrb[5].mxu0 }
 0x1fc   : > { %3692 = vst [vmem:[%s5780_s18 + $0x8] sm:$0xff] %v3656_v25  ;;  %v4536_v35 = vadd.f32 %v3449_v23, %v1493_v57  ;;  %v4500_v53 = vpop.f32.mrb[6].mxu0 }
 0x1fd   : > { %v3625_v26 = vadd.f32 %v4535_v22, %v5774_v49  ;;  %v4537_v28 = vadd.f32 %v4500_v53, %v4310_v9  ;;  %v3452_v41 = vpop.f32.mrb[7].mxu0 }
 0x1fe   : > { %v3623_v2 = vadd.f32 %v4536_v35, %v5774_v49  ;;  %v4538_v27 = vadd.f32 %v3452_v41, %v1496_v17 }
 0x1ff   : > { %v3661_v5 = vmax.f32 %v3625_v26, 0.0  ;;  %v3626_v32 = vadd.f32 %v4537_v28, %v5774_v49 }
 0x200   : > { %v3659_v20 = vmax.f32 %v3623_v2, 0.0  ;;  %v3624_v21 = vadd.f32 %v4538_v27, %v5774_v49 }
 0x201   : > { %3697 = vst [vmem:[%s5780_s18 + $0x30] sm:$0xff] %v3661_v5  ;;  %v3662_v44 = vmax.f32 %v3626_v32, 0.0 }
 0x202   : > { %3695 = vst [vmem:[%s5780_s18 + $0x20] sm:$0xff] %v3659_v20  ;;  %v3660_v55 = vmax.f32 %v3624_v21, 0.0  ;;  %v4503_v40 = vpop.f32.mrb[8].mxu0 }
 0x203   : > { %3698 = vst [vmem:[%s5780_s18 + $0x38] sm:$0xff] %v3662_v44  ;;  %v4539_v59 = vadd.f32 %v4503_v40, %v4313_v48  ;;  %v3465_v39 = vpop.f32.mrb[9].mxu0 }
 0x204   : > { %3696 = vst [vmem:[%s5780_s18 + $0x28] sm:$0xff] %v3660_v55  ;;  %v4540_v29 = vadd.f32 %v3465_v39, %v1509_v60  ;;  %v4504_v19 = vpop.f32.mrb[10].mxu0 }
 0x205   : > { %v3629_v36 = vadd.f32 %v4539_v59, %v5774_v49  ;;  %v4541_v3 = vadd.f32 %v4504_v19, %v4314_v24  ;;  %v3468_v43 = vpop.f32.mrb[11].mxu0 }
 0x206   : > { %v3627_v33 = vadd.f32 %v4540_v29, %v5774_v49  ;;  %v4542_v61 = vadd.f32 %v3468_v43, %v1512_v54 }
 0x207   : > { %v3665_v1 = vmax.f32 %v3629_v36, 0.0  ;;  %v3630_v51 = vadd.f32 %v4541_v3, %v5774_v49 }
 0x208   : > { %v3663_v62 = vmax.f32 %v3627_v33, 0.0  ;;  %v3628_v16 = vadd.f32 %v4542_v61, %v5774_v49 }
 0x209   : > { %3701 = vst [vmem:[%s5780_s18 + $0x50] sm:$0xff] %v3665_v1  ;;  %v3666_v14 = vmax.f32 %v3630_v51, 0.0 }
 0x20a   : > { %3699 = vst [vmem:[%s5780_s18 + $0x40] sm:$0xff] %v3663_v62  ;;  %v3664_v63 = vmax.f32 %v3628_v16, 0.0  ;;  %v4507_v57 = vpop.f32.mrb[12].mxu0 }
 0x20b   : > { %3702 = vst [vmem:[%s5780_s18 + $0x58] sm:$0xff] %v3666_v14  ;;  %v4543_v9 = vadd.f32 %v4507_v57, %v5754_v31  ;;  %v3481_v17 = vpop.f32.mrb[13].mxu0 }
 0x20c   : > { %3700 = vst [vmem:[%s5780_s18 + $0x48] sm:$0xff] %v3664_v63  ;;  %v4544_v48 = vadd.f32 %v3481_v17, %v5756_v0  ;;  %v4508_v60 = vpop.f32.mrb[14].mxu0 }
 0x20d   : > { %v3633_v24 = vadd.f32 %v4543_v9, %v5774_v49  ;;  %v4545_v54 = vadd.f32 %v4508_v60, %v5758_v56  ;;  %v3484_v38 = vpop.f32.mrb[15].mxu0 }
 0x20e   : > { %v3631_v4 = vadd.f32 %v4544_v48, %v5774_v49  ;;  %v4546_v11 = vadd.f32 %v3484_v38, %v5760_v13 }
 0x20f   : > { %v4363_v7 = vpop.f32.mrb[20].mxu1  ;;  %v3669_v6 = vmax.f32 %v3633_v24, 0.0  ;;  %v3634_v12 = vadd.f32 %v4545_v54, %v5774_v49 }
 0x210   : > { %v2003_v31 = vpop.f32.mrb[21].mxu1  ;;  %v3667_v0 = vmax.f32 %v3631_v4, 0.0  ;;  %v3632_v42 = vadd.f32 %v4546_v11, %v5774_v49 }
 0x211   : > { %v4364_v30 = vpop.f32.mrb[22].mxu1  ;;  %3705 = vst [vmem:[%s5780_s18 + $0x70] sm:$0xff] %v3669_v6  ;;  %v3670_v50 = vmax.f32 %v3634_v12, 0.0 }
 0x212   : > { %v2006_v46 = vpop.f32.mrb[23].mxu1  ;;  %3703 = vst [vmem:[%s5780_s18 + $0x60] sm:$0xff] %v3667_v0  ;;  %v3668_v56 = vmax.f32 %v3632_v42, 0.0  ;;  %v4511_v47 = vpop.f32.mrb[16].mxu0 }
 0x213   : > { %3706 = vst [vmem:[%s5780_s18 + $0x78] sm:$0xff] %v3670_v50  ;;  %v4547_v37 = vadd.f32 %v4511_v47, %v5762_v15  ;;  %v3497_v18 = vpop.f32.mrb[17].mxu0 }
 0x214   : > { %3704 = vst [vmem:[%s5780_s18 + $0x68] sm:$0xff] %v3668_v56  ;;  %v4548_v13 = vadd.f32 %v3497_v18, %v5764_v58  ;;  %v4512_v52 = vpop.f32.mrb[18].mxu0 }
 0x215   : > { %v3637_v10 = vadd.f32 %v4547_v37, %v5774_v49  ;;  %v4549_v25 = vadd.f32 %v4512_v52, %v5766_v8  ;;  %v3500_v45 = vpop.f32.mrb[19].mxu0 }
 0x216   : > { %v3635_v23 = vadd.f32 %v4548_v13, %v5774_v49  ;;  %v4550_v35 = vadd.f32 %v3500_v45, %v5768_v34 }
 0x217   : > { %v4367_v22 = vpop.f32.mrb[24].mxu1  ;;  %v3673_v53 = vmax.f32 %v3637_v10, 0.0  ;;  %v3638_v26 = vadd.f32 %v4549_v25, %v5774_v49 }
 0x218   : > { %v2019_v15 = vpop.f32.mrb[25].mxu1  ;;  %v3671_v58 = vmax.f32 %v3635_v23, 0.0  ;;  %v3636_v41 = vadd.f32 %v4550_v35, %v5774_v49 }
 0x219   : > { %v4368_v28 = vpop.f32.mrb[26].mxu1  ;;  %3709 = vst [vmem:[%s5780_s18 + $0x90] sm:$0xff] %v3673_v53  ;;  %v3674_v27 = vmax.f32 %v3638_v26, 0.0 }
 0x21a   : > { %v2022_v2 = vpop.f32.mrb[27].mxu1  ;;  %3707 = vst [vmem:[%s5780_s18 + $0x80] sm:$0xff] %v3671_v58  ;;  %v3672_v8 = vmax.f32 %v3636_v41, 0.0  ;;  %v4515_v5 = vpop.f32.mrb[20].mxu0 }
 0x21b   : > { %3710 = vst [vmem:[%s5780_s18 + $0x98] sm:$0xff] %v3674_v27  ;;  %v4551_v32 = vadd.f32 %v4515_v5, %v4363_v7  ;;  %v3513_v20 = vpop.f32.mrb[21].mxu0 }
 0x21c   : > { %3708 = vst [vmem:[%s5780_s18 + $0x88] sm:$0xff] %v3672_v8  ;;  %v4552_v34 = vadd.f32 %v3513_v20, %v2003_v31  ;;  %v4516_v21 = vpop.f32.mrb[22].mxu0 }
 0x21d   : > { %v3641_v44 = vadd.f32 %v4551_v32, %v5774_v49  ;;  %v4553_v55 = vadd.f32 %v4516_v21, %v4364_v30  ;;  %v3516_v40 = vpop.f32.mrb[23].mxu0 }
 0x21e   : > { %v3639_v39 = vadd.f32 %v4552_v34, %v5774_v49  ;;  %v4554_v29 = vadd.f32 %v3516_v40, %v2006_v46 }
 0x21f   : > { %v4371_v59 = vpop.f32.mrb[28].mxu1  ;;  %v3677_v36 = vmax.f32 %v3641_v44, 0.0  ;;  %v3642_v3 = vadd.f32 %v4553_v55, %v5774_v49 }
 0x220   : > { %v2035_v19 = vpop.f32.mrb[29].mxu1  ;;  %v3675_v33 = vmax.f32 %v3639_v39, 0.0  ;;  %v3640_v61 = vadd.f32 %v4554_v29, %v5774_v49 }
 0x221   : > { %v4372_v43 = vpop.f32.mrb[30].mxu1  ;;  %3713 = vst [vmem:[%s5780_s18 + $0xb0] sm:$0xff] %v3677_v36  ;;  %v3678_v51 = vmax.f32 %v3642_v3, 0.0 }
 0x222   : > { %v2038_v1 = vpop.f32.mrb[31].mxu1  ;;  %3711 = vst [vmem:[%s5780_s18 + $0xa0] sm:$0xff] %v3675_v33  ;;  %v3676_v62 = vmax.f32 %v3640_v61, 0.0  ;;  %v4519_v16 = vpop.f32.mrb[24].mxu0 }
 0x223   : > { %3714 = vst [vmem:[%s5780_s18 + $0xb8] sm:$0xff] %v3678_v51  ;;  %v4555_v14 = vadd.f32 %v4519_v16, %v4367_v22  ;;  %v3529_v63 = vpop.f32.mrb[25].mxu0 }
 0x224   : > { %3712 = vst [vmem:[%s5780_s18 + $0xa8] sm:$0xff] %v3676_v62  ;;  %v4556_v57 = vadd.f32 %v3529_v63, %v2019_v15  ;;  %v4520_v9 = vpop.f32.mrb[26].mxu0 }
 0x225   : > { %v3645_v17 = vadd.f32 %v4555_v14, %v5774_v49  ;;  %v4557_v48 = vadd.f32 %v4520_v9, %v4368_v28  ;;  %v3532_v60 = vpop.f32.mrb[27].mxu0 }
 0x226   : > { %v3643_v54 = vadd.f32 %v4556_v57, %v5774_v49  ;;  %v4558_v38 = vadd.f32 %v3532_v60, %v2022_v2 }
 0x227   : > { %v4375_v24 = vpop.f32.mrb[32].mxu1  ;;  %v3681_v4 = vmax.f32 %v3645_v17, 0.0  ;;  %v3646_v11 = vadd.f32 %v4557_v48, %v5774_v49 }
 0x228   : > { %v2051_v7 = vpop.f32.mrb[33].mxu1  ;;  %v3679_v6 = vmax.f32 %v3643_v54, 0.0  ;;  %v3644_v12 = vadd.f32 %v4558_v38, %v5774_v49 }
 0x229   : > { %v4376_v31 = vpop.f32.mrb[34].mxu1  ;;  %3717 = vst [vmem:[%s5780_s18 + $0xd0] sm:$0xff] %v3681_v4  ;;  %v3682_v0 = vmax.f32 %v3646_v11, 0.0 }
 0x22a   : > { %v2054_v30 = vpop.f32.mrb[35].mxu1  ;;  %3715 = vst [vmem:[%s5780_s18 + $0xc0] sm:$0xff] %v3679_v6  ;;  %v3680_v42 = vmax.f32 %v3644_v12, 0.0  ;;  %v4523_v46 = vpop.f32.mrb[28].mxu0 }
 0x22b   : > { %3718 = vst [vmem:[%s5780_s18 + $0xd8] sm:$0xff] %v3682_v0  ;;  %v4559_v50 = vadd.f32 %v4523_v46, %v4371_v59  ;;  %v3545_v56 = vpop.f32.mrb[29].mxu0 }
 0x22c   : > { %3716 = vst [vmem:[%s5780_s18 + $0xc8] sm:$0xff] %v3680_v42  ;;  %v4560_v47 = vadd.f32 %v3545_v56, %v2035_v19  ;;  %v4524_v37 = vpop.f32.mrb[30].mxu0 }
 0x22d   : > { %v3649_v18 = vadd.f32 %v4559_v50, %v5774_v49  ;;  %v4561_v13 = vadd.f32 %v4524_v37, %v4372_v43  ;;  %v3548_v52 = vpop.f32.mrb[31].mxu0 }
 0x22e   : > { %v3647_v10 = vadd.f32 %v4560_v47, %v5774_v49  ;;  %v4562_v25 = vadd.f32 %v3548_v52, %v2038_v1 }
 0x22f   : > { %v3685_v45 = vmax.f32 %v3649_v18, 0.0  ;;  %v3650_v22 = vadd.f32 %v4561_v13, %v5774_v49 }
 0x230   : > { %v3683_v23 = vmax.f32 %v3647_v10, 0.0  ;;  %v3648_v35 = vadd.f32 %v4562_v25, %v5774_v49 }
 0x231   : > { %3721 = vst [vmem:[%s5780_s18 + $0xf0] sm:$0xff] %v3685_v45  ;;  %v3686_v15 = vmax.f32 %v3650_v22, 0.0 }
 0x232   : > { %3719 = vst [vmem:[%s5780_s18 + $0xe0] sm:$0xff] %v3683_v23  ;;  %v3684_v53 = vmax.f32 %v3648_v35, 0.0  ;;  %v4527_v26 = vpop.f32.mrb[32].mxu0 }
 0x233   : > { %3722 = vst [vmem:[%s5780_s18 + $0xf8] sm:$0xff] %v3686_v15  ;;  %v4563_v28 = vadd.f32 %v4527_v26, %v4375_v24  ;;  %v3561_v58 = vpop.f32.mrb[33].mxu0 }
 0x234   : > { %3720 = vst [vmem:[%s5780_s18 + $0xe8] sm:$0xff] %v3684_v53  ;;  %v4564_v41 = vadd.f32 %v3561_v58, %v2051_v7  ;;  %v4528_v2 = vpop.f32.mrb[34].mxu0 }
 0x235   : > { %v3653_v27 = vadd.f32 %v4563_v28, %v5774_v49  ;;  %v4565_v8 = vadd.f32 %v4528_v2, %v4376_v31  ;;  %v3564_v5 = vpop.f32.mrb[35].mxu0 }
 0x236   : > { %v3651_v32 = vadd.f32 %v4564_v41, %v5774_v49  ;;  %v4566_v20 = vadd.f32 %v3564_v5, %v2054_v30 }
 0x237   : > { %v3689_v34 = vmax.f32 %v3653_v27, 0.0  ;;  %v3654_v21 = vadd.f32 %v4565_v8, %v5774_v49 }
 0x238   : > { %v3687_v44 = vmax.f32 %v3651_v32, 0.0  ;;  %v3652_v55 = vadd.f32 %v4566_v20, %v5774_v49 }
 0x239   : > { %3725 = vst [vmem:[%s5780_s18 + $0x110] sm:$0xff] %v3689_v34  ;;  %v3690_v40 = vmax.f32 %v3654_v21, 0.0 }
 0x23a   : > { %3723 = vst [vmem:[%s5780_s18 + $0x100] sm:$0xff] %v3687_v44  ;;  %v3688_v59 = vmax.f32 %v3652_v55, 0.0 }
 0x23b   : > { %3726 = vst [vmem:[%s5780_s18 + $0x118] sm:$0xff] %v3690_v40 }
 0x23c   : > { %3724 = vst [vmem:[%s5780_s18 + $0x108] sm:$0xff] %v3688_v59 }
 0x23d PF: > { %s13_s12 = sadd.s32 1, %s4918_s12  }
 0x23e   : > { %p10_p4 = scmp.ge.s32.totalorder %s13_s12, 4  }
 0x240   :  { %12 = sbr.rel (!%p10_p4) target bundleno = 1 (0x1), region = 62 }

</bundles_post_ra>
